<compile_context>
chip_gen: v5e
topology: v5e:2x2
jax: 0.10.0
libtpu: 0.0.40
codegen_flags: <defaults>
</compile_context>

<pallas_src>
import jax
import jax.numpy as jnp
from jax.experimental import pallas as pl
from jax.experimental.pallas import tpu as pltpu

POS = 0  # index into flattened `scores` (undefined constant in original code)
NEG = 1


def _round_up(a: int, b: int) -> int:
    return ((a + b - 1) // b) * b


def _structured_kernel(x_ref, w_ref, o_ref):
    # x_ref: VMEM (TILE_N, dim)  -- dim on the lane axis (canonical MXU lhs)
    # w_ref: VMEM (1, dim)       -- pre-selected weight row, resident across grid
    # o_ref: VMEM (TILE_N, 1)    -- per-row dot products (== (w @ x.T) transposed)
    o_ref[...] = jax.lax.dot_general(
        x_ref[...], w_ref[...],
        dimension_numbers=(((1,), (1,)), ((), ())),  # contract over dim
        preferred_element_type=jnp.float32,
    ).astype(o_ref.dtype)


def structured_layer_forward(x, scores, w_pos, w_neg, *, dim,
                             support_tagging=True,
                             compute_dtype=None,
                             tile_n=1024):
    """Pallas equivalent of structured_layer.forward; returns (1, N).

    compute_dtype: optionally cast x / w (e.g. jnp.bfloat16) to halve HBM
    traffic; the MXU still accumulates in f32 and the output keeps x's dtype.
    """
    if x.size % dim != 0:
        raise ValueError(f"x.size={x.size} is not divisible by dim={dim}")
    x2 = x.reshape(-1, dim)
    s1 = scores.reshape(-1)
    if s1.shape[0] < 2:
        raise ValueError("scores must contain at least 2 elements (POS, NEG)")

    N = x2.shape[0]
    out_dtype = x2.dtype

    # Branch on the tag scores once, outside the grid (traced jnp.where; avoids
    # shipping both weight rows + the scores vector into every grid step).
    if support_tagging:
        w = jnp.where(s1[POS] > s1[NEG],
                      w_pos.reshape(1, dim), w_neg.reshape(1, dim))
    else:
        w = w_neg.reshape(1, dim)

    if compute_dtype is not None:
        x2 = x2.astype(compute_dtype)
        w = w.astype(compute_dtype)

    # Row-tile size: multiple of 128, capped so tiny inputs don't over-allocate
    # VMEM.  No HBM padding of x: the grid is cdiv(N, tile) and Pallas masks
    # the boundary block's reads/writes (per-row independence makes that safe).
    tile = max(128, min(_round_up(tile_n, 128), _round_up(N, 128)))
    grid = (pl.cdiv(N, tile),)

    in_itemsize = jnp.dtype(x2.dtype).itemsize
    out_itemsize = jnp.dtype(out_dtype).itemsize
    cost = pl.CostEstimate(
        flops=2 * N * dim,
        transcendentals=0,
        bytes_accessed=N * dim * in_itemsize + dim * in_itemsize + N * out_itemsize,
    )

    out = pl.pallas_call(
        _structured_kernel,
        out_shape=jax.ShapeDtypeStruct((N, 1), out_dtype),
        grid_spec=pltpu.PrefetchScalarGridSpec(
            num_scalar_prefetch=0,
            grid=grid,
            in_specs=[
                pl.BlockSpec((tile, dim), lambda i: (i, 0)),  # streamed x tile
                pl.BlockSpec((1, dim), lambda i: (0, 0)),     # weight, resident
            ],
            out_specs=pl.BlockSpec((tile, 1), lambda i: (i, 0)),
        ),
        compiler_params=pltpu.CompilerParams(
            dimension_semantics=("parallel",),  # shard N axis across TCs (v7x)
        ),
        cost_estimate=cost,
    )(x2, w)

    # Present (1, N) to match torch.mm(w, x.t()); tiny reshape, no big transpose.
    return out[:, 0][None, :]


if __name__ == "__main__":
    key = jax.random.PRNGKey(0)
    k_x, k_s, k_wp, k_wn = jax.random.split(key, 4)

    dim = 200   # module default
    N = 1000    # time frames after x.view(-1, dim); deliberately NOT a multiple
                # of the tile (exercises the masked boundary block, no HBM pad)

    x = jax.random.normal(k_x, (N, dim), dtype=jnp.float32)
    scores = jax.random.normal(k_s, (2,), dtype=jnp.float32)  # [POS, NEG] tag scores

    # Module initializes w_pos / w_neg as zeros (trainable); we use deterministic
    # random values so the kernel output is non-trivial.
    w_pos = jax.random.normal(k_wp, (1, dim), dtype=jnp.float32)
    w_neg = jax.random.normal(k_wn, (1, dim), dtype=jnp.float32)

    w_sel = jnp.where(scores[POS] > scores[NEG], w_pos, w_neg)

    # --- f32 path, single (boundary) tile ---------------------------------
    out = structured_layer_forward(x, scores, w_pos, w_neg, dim=dim)
    out = jax.block_until_ready(out)
    ref = w_sel @ x.T
    assert out.shape == (1, N)
    assert jnp.allclose(out, ref, atol=1e-4, rtol=1e-4)

    # --- no-tagging branch (always w_neg) ----------------------------------
    out_nt = structured_layer_forward(x, scores, w_pos, w_neg, dim=dim,
                                      support_tagging=False)
    out_nt = jax.block_until_ready(out_nt)
    ref_nt = w_neg @ x.T
    assert out_nt.shape == (1, N)
    assert jnp.allclose(out_nt, ref_nt, atol=1e-4, rtol=1e-4)

    # --- bf16-input path, multi-tile grid + boundary block -----------------
    out_bf = structured_layer_forward(x, scores, w_pos, w_neg, dim=dim,
                                      compute_dtype=jnp.bfloat16,
                                      tile_n=256)
    out_bf = jax.block_until_ready(out_bf)
    ref_bf = (w_sel.astype(jnp.bfloat16).astype(jnp.float32)
              @ x.astype(jnp.bfloat16).astype(jnp.float32).T)
    assert out_bf.shape == (1, N)
    assert jnp.allclose(out_bf, ref_bf, atol=1e-2, rtol=1e-2)

    print("KERNEL_OK")
</pallas_src>

<mosaic_0001>
module attributes {stable_mosaic.version = 11 : i64} {
  func.func @_structured_kernel(%arg0: i32, %arg1: memref<1024x200xf32, #tpu.memory_space<vmem>>, %arg2: memref<1x200xf32, #tpu.memory_space<vmem>>, %arg3: memref<1024x1xf32, #tpu.memory_space<vmem>>) attributes {dimension_semantics = [#tpu.dimension_semantics<parallel>], iteration_bounds = array<i64: 1>, scalar_prefetch = 0 : i64, scratch_operands = 0 : i64, tpu.core_type = #tpu.core_type<tc>, window_params = [{transform_indices = @transform_0, window_bounds = array<i64: 1024, 200>}, {pipeline_mode = #tpu.pipeline_mode<synchronous>, transform_indices = @transform_1, window_bounds = array<i64: 1, 200>}, {transform_indices = @transform_2, window_bounds = array<i64: 1024, 1>}]} {
    %c0 = arith.constant 0 : index
    %c0_0 = arith.constant 0 : index
    %0 = vector.load %arg1[%c0, %c0_0] : memref<1024x200xf32, #tpu.memory_space<vmem>>, vector<1024x200xf32>
    %c0_1 = arith.constant 0 : index
    %c0_2 = arith.constant 0 : index
    %1 = vector.load %arg2[%c0_1, %c0_2] : memref<1x200xf32, #tpu.memory_space<vmem>>, vector<1x200xf32>
    %cst = arith.constant dense<0.000000e+00> : vector<1024x1xf32>
    %2 = tpu.matmul %0, %1, %cst {dimension_numbers = #tpu.dot_dimension_numbers<[1], [1], [0], [0], [0, 0, 1, 0], [], []>} : vector<1024x200xf32>, vector<1x200xf32>, vector<1024x1xf32> -> vector<1024x1xf32>
    %c0_3 = arith.constant 0 : index
    %c0_4 = arith.constant 0 : index
    %3 = vector.load %arg3[%c0_3, %c0_4] : memref<1024x1xf32, #tpu.memory_space<vmem>>, vector<1024x1xf32>
    tpu.vector_store %arg3[%c0_3, %c0_4], %2 {strides = array<i32>} : memref<1024x1xf32, #tpu.memory_space<vmem>>, vector<1024x1xf32>,
    return
  }
  func.func @transform_0(%arg0: i32) -> (i32, i32) {
    %c0_i32 = arith.constant 0 : i32
    %c0_i32_0 = arith.constant 0 : i32
    return %arg0, %c0_i32 : i32, i32
  }
  func.func @transform_1(%arg0: i32) -> (i32, i32) {
    %c0_i32 = arith.constant 0 : i32
    %c0_i32_0 = arith.constant 0 : i32
    %c0_i32_1 = arith.constant 0 : i32
    return %c0_i32, %c0_i32_0 : i32, i32
  }
  func.func @transform_2(%arg0: i32) -> (i32, i32) {
    %c0_i32 = arith.constant 0 : i32
    %c0_i32_0 = arith.constant 0 : i32
    return %arg0, %c0_i32 : i32, i32
  }
}

</mosaic_0001>

<bundles_post_ra>
// kernel: tpu_custom_call.1
= control target key start
LH: loop header
LB: loop body
LE: loop exit
PB: predicated region body
PF: predicated region fallthrough
CT: control target
= control target key end

     0   :  { %vm529_vm0 = vcmask 588800   ;;  %vm1042_vm1 = vcmask 7168   ;;  %s3382_s0 = inlined_call_operand.vmem [shape: f32[1000,200], index: 0, kind: input, shape index: {}]   ;;  %s3383_s1 = inlined_call_operand.vmem [shape: f32[1,200], index: 1, kind: input, shape index: {}]   ;;  %s3384_s2 = inlined_call_operand.vmem [shape: f32[1000,1], index: 2, kind: output, shape index: {}]  }
   0x1   :  { %v15_v0 = vld [vmem:[%s3382_s0 + $0x20] sm:$0xff]  ;;  %v16_v1 = vld [vmem:[%s3382_s0 + $0x28] sm:$0xff]  ;;  %v18_v9 = vld [vmem:[%s3382_s0 + $0x38] sm:$0xff] }
   0x2   :  { %v267_v2 = vld [vmem:[%s3383_s1] sm:$0x3]  ;;  %v12_v6 = vld [vmem:[%s3382_s0 + $0x8] sm:$0xff]  ;;  %v14_v14 = vld [vmem:[%s3382_s0 + $0x18] sm:$0xff] }
   0x3   :  { %v1732_v3 = vperm.slane %v267_v2, 0  ;;  %v1734_v4 = vperm.slane %v267_v2, 1  ;;  %v11_v5 = vld [vmem:[%s3382_s0] sm:$0xff]  ;;  %v20_v8 = vld [vmem:[%s3382_s0 + $0x48] sm:$0xff]  ;;  %v17_v19 = vld [vmem:[%s3382_s0 + $0x30] sm:$0xff] }
   0x4   :  { %v19_v7 = vld [vmem:[%s3382_s0 + $0x40] sm:$0xff]  ;;  %v13_v21 = vld [vmem:[%s3382_s0 + $0x10] sm:$0xff]  ;;  %v22_v23 = vld [vmem:[%s3382_s0 + $0x58] sm:$0xff] }
   0x5   :  { %v277_v10 = vmul.f32 %v1732_v3, %v15_v0  ;;  %v278_v11 = vmul.f32 %v1734_v4, %v16_v1  ;;  %v273_v12 = vmul.f32 %v1732_v3, %v11_v5  ;;  %v274_v13 = vmul.f32 %v1734_v4, %v12_v6  ;;  %v21_v27 = vld [vmem:[%s3382_s0 + $0x50] sm:$0xff]  ;;  %v26_v36 = vld [vmem:[%s3382_s0 + $0x78] sm:$0xff]  ;;  %v24_v37 = vld [vmem:[%s3382_s0 + $0x68] sm:$0xff] }
   0x6   :  { %v281_v15 = vmul.f32 %v1732_v3, %v19_v7  ;;  %v282_v16 = vmul.f32 %v1734_v4, %v20_v8  ;;  %v280_v20 = vmul.f32 %v1734_v4, %v18_v9  ;;  %v276_v22 = vmul.f32 %v1734_v4, %v14_v14  ;;  %v28_v38 = vld [vmem:[%s3382_s0 + $0x88] sm:$0xff]  ;;  %v25_v42 = vld [vmem:[%s3382_s0 + $0x70] sm:$0xff]  ;;  %v23_v44 = vld [vmem:[%s3382_s0 + $0x60] sm:$0xff] }
   0x7   :  { %v538_v17 = vsel %vm529_vm0, %v278_v11, 0.0  ;;  %v530_v18 = vsel %vm529_vm0, %v274_v13, 0.0  ;;  %v279_v29 = vmul.f32 %v1732_v3, %v17_v19  ;;  %v275_v30 = vmul.f32 %v1732_v3, %v13_v21  ;;  %v27_v46 = vld [vmem:[%s3382_s0 + $0x80] sm:$0xff]  ;;  %v32_v54 = vld [vmem:[%s3382_s0 + $0xa8] sm:$0xff]  ;;  %v30_v55 = vld [vmem:[%s3382_s0 + $0x98] sm:$0xff] }
   0x8   :  { %v539_v24 = vadd.f32 %v538_v17, %v277_v10  ;;  %v531_v25 = vadd.f32 %v530_v18, %v273_v12  ;;  %v546_v26 = vsel %vm529_vm0, %v282_v16, 0.0  ;;  %v284_v31 = vmul.f32 %v1734_v4, %v22_v23  ;;  %v34_v56 = vld [vmem:[%s3382_s0 + $0xb8] sm:$0xff]  ;;  %v31_v60 = vld [vmem:[%s3382_s0 + $0xa0] sm:$0xff]  ;;  %v29_v62 = vld [vmem:[%s3382_s0 + $0x90] sm:$0xff] }
   0x9   :  { %v547_v28 = vadd.f32 %v546_v26, %v281_v15  ;;  %v542_v32 = vsel %vm529_vm0, %v280_v20, 0.0  ;;  %v534_v33 = vsel %vm529_vm0, %v276_v22, 0.0  ;;  %v283_v34 = vmul.f32 %v1732_v3, %v21_v27  ;;  %v33_v0 = vld [vmem:[%s3382_s0 + $0xb0] sm:$0xff]  ;;  %v38_v10 = vld [vmem:[%s3382_s0 + $0xd8] sm:$0xff]  ;;  %v36_v11 = vld [vmem:[%s3382_s0 + $0xc8] sm:$0xff] }
   0xa   :  { %540 = vadd.xlane.f32.xlu1 %v539_v24  ;;  %532 = vadd.xlane.f32.xlu0 %v531_v25  ;;  %v550_v35 = vsel %vm529_vm0, %v284_v31, 0.0  ;;  %v543_v39 = vadd.f32 %v542_v32, %v279_v29  ;;  %v535_v40 = vadd.f32 %v534_v33, %v275_v30  ;;  %v288_v43 = vmul.f32 %v1734_v4, %v26_v36  ;;  %v40_v12 = vld [vmem:[%s3382_s0 + $0xe8] sm:$0xff]  ;;  %v37_v16 = vld [vmem:[%s3382_s0 + $0xd0] sm:$0xff]  ;;  %v35_v18 = vld [vmem:[%s3382_s0 + $0xc0] sm:$0xff] }
   0xb   :  { %548 = vadd.xlane.f32.xlu2 %v547_v28  ;;  %v551_v41 = vadd.f32 %v550_v35, %v283_v34  ;;  %v286_v45 = vmul.f32 %v1734_v4, %v24_v37  ;;  %v290_v47 = vmul.f32 %v1734_v4, %v28_v38  ;;  %v287_v48 = vmul.f32 %v1732_v3, %v25_v42  ;;  %v39_v20 = vld [vmem:[%s3382_s0 + $0xe0] sm:$0xff]  ;;  %v44_v28 = vld [vmem:[%s3382_s0 + $0x108] sm:$0xff]  ;;  %v42_v29 = vld [vmem:[%s3382_s0 + $0xf8] sm:$0xff] }
   0xc   :  { %v285_v49 = vmul.f32 %v1732_v3, %v23_v44  ;;  %v558_v50 = vsel %vm529_vm0, %v288_v43, 0.0  ;;  %v289_v52 = vmul.f32 %v1732_v3, %v27_v46  ;;  %v294_v61 = vmul.f32 %v1734_v4, %v32_v54  ;;  %v46_v30 = vld [vmem:[%s3382_s0 + $0x118] sm:$0xff]  ;;  %v43_v34 = vld [vmem:[%s3382_s0 + $0x100] sm:$0xff]  ;;  %v41_v36 = vld [vmem:[%s3382_s0 + $0xf0] sm:$0xff] }
   0xd   :  { %v554_v51 = vsel %vm529_vm0, %v286_v45, 0.0  ;;  %v562_v53 = vsel %vm529_vm0, %v290_v47, 0.0  ;;  %v559_v57 = vadd.f32 %v558_v50, %v287_v48  ;;  %v292_v63 = vmul.f32 %v1734_v4, %v30_v55  ;;  %v45_v38 = vld [vmem:[%s3382_s0 + $0x110] sm:$0xff]  ;;  %v50_v46 = vld [vmem:[%s3382_s0 + $0x138] sm:$0xff]  ;;  %v48_v47 = vld [vmem:[%s3382_s0 + $0x128] sm:$0xff] }
   0xe   :  { %v555_v58 = vadd.f32 %v554_v51, %v285_v49  ;;  %v563_v59 = vadd.f32 %v562_v53, %v289_v52  ;;  %v296_v1 = vmul.f32 %v1734_v4, %v34_v56  ;;  %v293_v2 = vmul.f32 %v1732_v3, %v31_v60  ;;  %v52_v48 = vld [vmem:[%s3382_s0 + $0x148] sm:$0xff]  ;;  %v49_v52 = vld [vmem:[%s3382_s0 + $0x130] sm:$0xff]  ;;  %v47_v54 = vld [vmem:[%s3382_s0 + $0x120] sm:$0xff] }
   0xf   :  { %v291_v5 = vmul.f32 %v1732_v3, %v29_v62  ;;  %v570_v6 = vsel %vm529_vm0, %v294_v61, 0.0  ;;  %v566_v7 = vsel %vm529_vm0, %v292_v63, 0.0  ;;  %v295_v8 = vmul.f32 %v1732_v3, %v33_v0  ;;  %v51_v56 = vld [vmem:[%s3382_s0 + $0x140] sm:$0xff]  ;;  %v56_v0 = vld [vmem:[%s3382_s0 + $0x168] sm:$0xff] }
  0x10   :  { %v574_v9 = vsel %vm529_vm0, %v296_v1, 0.0  ;;  %v571_v13 = vadd.f32 %v570_v6, %v293_v2  ;;  %v300_v17 = vmul.f32 %v1734_v4, %v38_v10  ;;  %v298_v19 = vmul.f32 %v1734_v4, %v36_v11  ;;  %v54_v1 = vld [vmem:[%s3382_s0 + $0x158] sm:$0xff]  ;;  %v53_v10 = vld [vmem:[%s3382_s0 + $0x150] sm:$0xff] }
  0x11   :  { %v567_v14 = vadd.f32 %v566_v7, %v291_v5  ;;  %v575_v15 = vadd.f32 %v574_v9, %v295_v8  ;;  %v302_v21 = vmul.f32 %v1734_v4, %v40_v12  ;;  %v299_v22 = vmul.f32 %v1732_v3, %v37_v16  ;;  %v58_v2 = vld [vmem:[%s3382_s0 + $0x178] sm:$0xff]  ;;  %v55_v8 = vld [vmem:[%s3382_s0 + $0x160] sm:$0xff]  ;;  %v57_v12 = vld [vmem:[%s3382_s0 + $0x170] sm:$0xff] }
  0x12   :  { %544 = vadd.xlane.f32.xlu1 %v543_v39  ;;  %536 = vadd.xlane.f32.xlu0 %v535_v40  ;;  %v297_v23 = vmul.f32 %v1732_v3, %v35_v18  ;;  %v582_v24 = vsel %vm529_vm0, %v300_v17, 0.0  ;;  %v578_v25 = vsel %vm529_vm0, %v298_v19, 0.0  ;;  %v301_v26 = vmul.f32 %v1732_v3, %v39_v20  ;;  %v62_v20 = vld [vmem:[%s3382_s0 + $0x198] sm:$0xff] }
  0x13   :  { %552 = vadd.xlane.f32.xlu2 %v551_v41  ;;  %v586_v27 = vsel %vm529_vm0, %v302_v21, 0.0  ;;  %v583_v31 = vadd.f32 %v582_v24, %v299_v22  ;;  %v306_v35 = vmul.f32 %v1734_v4, %v44_v28  ;;  %v304_v37 = vmul.f32 %v1734_v4, %v42_v29  ;;  %v60_v21 = vld [vmem:[%s3382_s0 + $0x188] sm:$0xff]  ;;  %v59_v28 = vld [vmem:[%s3382_s0 + $0x180] sm:$0xff] }
  0x14   :  { %v579_v32 = vadd.f32 %v578_v25, %v297_v23  ;;  %v587_v33 = vadd.f32 %v586_v27, %v301_v26  ;;  %v308_v39 = vmul.f32 %v1734_v4, %v46_v30  ;;  %v305_v40 = vmul.f32 %v1732_v3, %v43_v34  ;;  %v64_v22 = vld [vmem:[%s3382_s0 + $0x1a8] sm:$0xff]  ;;  %v61_v26 = vld [vmem:[%s3382_s0 + $0x190] sm:$0xff]  ;;  %v63_v30 = vld [vmem:[%s3382_s0 + $0x1a0] sm:$0xff] }
  0x15   :  { %v303_v41 = vmul.f32 %v1732_v3, %v41_v36  ;;  %v594_v42 = vsel %vm529_vm0, %v306_v35, 0.0  ;;  %v590_v43 = vsel %vm529_vm0, %v304_v37, 0.0  ;;  %v307_v44 = vmul.f32 %v1732_v3, %v45_v38  ;;  %v68_v38 = vld [vmem:[%s3382_s0 + $0x1c8] sm:$0xff] }
  0x16   :  { %v598_v45 = vsel %vm529_vm0, %v308_v39, 0.0  ;;  %v595_v49 = vadd.f32 %v594_v42, %v305_v40  ;;  %v312_v53 = vmul.f32 %v1734_v4, %v50_v46  ;;  %v310_v55 = vmul.f32 %v1734_v4, %v48_v47  ;;  %v66_v39 = vld [vmem:[%s3382_s0 + $0x1b8] sm:$0xff]  ;;  %v65_v46 = vld [vmem:[%s3382_s0 + $0x1b0] sm:$0xff] }
  0x17   :  { %v591_v50 = vadd.f32 %v590_v43, %v303_v41  ;;  %v599_v51 = vadd.f32 %v598_v45, %v307_v44  ;;  %v313_v62 = vmul.f32 %v1732_v3, %v51_v56  ;;  %v318_v9 = vmul.f32 %v1734_v4, %v56_v0  ;;  %v70_v40 = vld [vmem:[%s3382_s0 + $0x1d8] sm:$0xff]  ;;  %v67_v44 = vld [vmem:[%s3382_s0 + $0x1c0] sm:$0xff] }
  0x18   :  { %v606_v60 = vsel %vm529_vm0, %v312_v53, 0.0  ;;  %v602_v61 = vsel %vm529_vm0, %v310_v55, 0.0  ;;  %v316_v11 = vmul.f32 %v1734_v4, %v54_v1  ;;  %v319_v18 = vmul.f32 %v1732_v3, %v57_v12  ;;  %v74_v56 = vld [vmem:[%s3382_s0 + $0x1f8] sm:$0xff]  ;;  %v71_v0 = vld [vmem:[%s3382_s0 + $0x1e0] sm:$0xff]  ;;  %v80_v12 = vld [vmem:[%s3382_s0 + $0x228] sm:$0xff] }
  0x19   :  { %v618_v16 = vsel %vm529_vm0, %v318_v9, 0.0  ;;  %v324_v27 = vmul.f32 %v1734_v4, %v62_v20  ;;  %v322_v29 = vmul.f32 %v1734_v4, %v60_v21  ;;  %v325_v36 = vmul.f32 %v1732_v3, %v63_v30  ;;  %v77_v20 = vld [vmem:[%s3382_s0 + $0x210] sm:$0xff]  ;;  %v86_v30 = vld [vmem:[%s3382_s0 + $0x258] sm:$0xff] }
  0x1a   :  { %560 = vadd.xlane.f32.xlu1 %v559_v57  ;;  %556 = vadd.xlane.f32.xlu0 %v555_v58  ;;  %v314_v57 = vmul.f32 %v1734_v4, %v52_v48  ;;  %v311_v58 = vmul.f32 %v1732_v3, %v49_v52  ;;  %v614_v17 = vsel %vm529_vm0, %v316_v11, 0.0  ;;  %v330_v45 = vmul.f32 %v1734_v4, %v68_v38  ;;  %v69_v48 = vld [vmem:[%s3382_s0 + $0x1d0] sm:$0xff]  ;;  %v83_v38 = vld [vmem:[%s3382_s0 + $0x240] sm:$0xff] }
  0x1b   :  { %564 = vadd.xlane.f32.xlu2 %v563_v59  ;;  %v309_v59 = vmul.f32 %v1732_v3, %v47_v54  ;;  %v630_v34 = vsel %vm529_vm0, %v324_v27, 0.0  ;;  %v626_v35 = vsel %vm529_vm0, %v322_v29, 0.0  ;;  %v328_v47 = vmul.f32 %v1734_v4, %v66_v39 }
  0x1c   :  { %v610_v63 = vsel %vm529_vm0, %v314_v57, 0.0  ;;  %v607_v5 = vadd.f32 %v606_v60, %v311_v58  ;;  %v642_v52 = vsel %vm529_vm0, %v330_v45, 0.0  ;;  %v331_v54 = vmul.f32 %v1732_v3, %v69_v48  ;;  %v72_v57 = vld [vmem:[%s3382_s0 + $0x1e8] sm:$0xff] }
  0x1d   :  { %v603_v6 = vadd.f32 %v602_v61, %v309_v59  ;;  %v611_v7 = vadd.f32 %v610_v63, %v313_v62  ;;  %v638_v53 = vsel %vm529_vm0, %v328_v47, 0.0  ;;  %v76_v58 = vld [vmem:[%s3382_s0 + $0x208] sm:$0xff]  ;;  %v73_v62 = vld [vmem:[%s3382_s0 + $0x1f0] sm:$0xff]  ;;  %v336_v63 = vmul.f32 %v1734_v4, %v74_v56 }
  0x1e   :  { %v334_v1 = vmul.f32 %v1734_v4, %v72_v57  ;;  %v92_v48 = vld [vmem:[%s3382_s0 + $0x288] sm:$0xff]  ;;  %v89_v56 = vld [vmem:[%s3382_s0 + $0x270] sm:$0xff] }
  0x20   :  { %v650_v9 = vsel %vm529_vm0, %v334_v1, 0.0 }
  0x22   :  { %572 = vadd.xlane.f32.xlu1 %v571_v13  ;;  %568 = vadd.xlane.f32.xlu0 %v567_v14  ;;  %v320_v13 = vmul.f32 %v1734_v4, %v58_v2  ;;  %v317_v14 = vmul.f32 %v1732_v3, %v55_v8  ;;  %v75_v2 = vld [vmem:[%s3382_s0 + $0x200] sm:$0xff]  ;;  %v654_v8 = vsel %vm529_vm0, %v336_v63, 0.0 }
  0x23   :  { %576 = vadd.xlane.f32.xlu2 %v575_v15  ;;  %v315_v15 = vmul.f32 %v1732_v3, %v53_v10  ;;  %v337_v10 = vmul.f32 %v1732_v3, %v75_v2  ;;  %v98_v2 = vld [vmem:[%s3382_s0 + $0x2b8] sm:$0xff] }
  0x24   :  { %v622_v19 = vsel %vm529_vm0, %v320_v13, 0.0  ;;  %v619_v23 = vadd.f32 %v618_v16, %v317_v14  ;;  %v78_v13 = vld [vmem:[%s3382_s0 + $0x218] sm:$0xff] }
  0x25   :  { %v615_v24 = vadd.f32 %v614_v17, %v315_v15  ;;  %v623_v25 = vadd.f32 %v622_v19, %v319_v18  ;;  %v82_v14 = vld [vmem:[%s3382_s0 + $0x238] sm:$0xff]  ;;  %v79_v18 = vld [vmem:[%s3382_s0 + $0x220] sm:$0xff]  ;;  %v342_v19 = vmul.f32 %v1734_v4, %v80_v12  ;;  %v340_v21 = vmul.f32 %v1734_v4, %v78_v13 }
  0x26   :  { %v95_v12 = vld [vmem:[%s3382_s0 + $0x2a0] sm:$0xff] }
  0x27   :  { %v662_v27 = vsel %vm529_vm0, %v340_v21, 0.0 }
  0x2a   :  { %584 = vadd.xlane.f32.xlu1 %v583_v31  ;;  %580 = vadd.xlane.f32.xlu0 %v579_v32  ;;  %v326_v31 = vmul.f32 %v1734_v4, %v64_v22  ;;  %v323_v32 = vmul.f32 %v1732_v3, %v61_v26  ;;  %v81_v22 = vld [vmem:[%s3382_s0 + $0x230] sm:$0xff]  ;;  %v666_v26 = vsel %vm529_vm0, %v342_v19, 0.0 }
  0x2b   :  { %588 = vadd.xlane.f32.xlu2 %v587_v33  ;;  %v321_v33 = vmul.f32 %v1732_v3, %v59_v28  ;;  %v343_v28 = vmul.f32 %v1732_v3, %v81_v22  ;;  %v104_v22 = vld [vmem:[%s3382_s0 + $0x2e8] sm:$0xff] }
  0x2c   :  { %v634_v37 = vsel %vm529_vm0, %v326_v31, 0.0  ;;  %v631_v41 = vadd.f32 %v630_v34, %v323_v32  ;;  %v84_v31 = vld [vmem:[%s3382_s0 + $0x248] sm:$0xff] }
  0x2d   :  { %v627_v42 = vadd.f32 %v626_v35, %v321_v33  ;;  %v635_v43 = vadd.f32 %v634_v37, %v325_v36  ;;  %v88_v32 = vld [vmem:[%s3382_s0 + $0x268] sm:$0xff]  ;;  %v85_v36 = vld [vmem:[%s3382_s0 + $0x250] sm:$0xff]  ;;  %v348_v37 = vmul.f32 %v1734_v4, %v86_v30  ;;  %v346_v39 = vmul.f32 %v1734_v4, %v84_v31 }
  0x2e   :  { %v101_v30 = vld [vmem:[%s3382_s0 + $0x2d0] sm:$0xff] }
  0x2f   :  { %v674_v45 = vsel %vm529_vm0, %v346_v39, 0.0 }
  0x32   :  { %596 = vadd.xlane.f32.xlu1 %v595_v49  ;;  %592 = vadd.xlane.f32.xlu0 %v591_v50  ;;  %v332_v49 = vmul.f32 %v1734_v4, %v70_v40  ;;  %v329_v50 = vmul.f32 %v1732_v3, %v67_v44  ;;  %v87_v40 = vld [vmem:[%s3382_s0 + $0x260] sm:$0xff]  ;;  %v678_v44 = vsel %vm529_vm0, %v348_v37, 0.0 }
  0x33   :  { %600 = vadd.xlane.f32.xlu2 %v599_v51  ;;  %v327_v51 = vmul.f32 %v1732_v3, %v65_v46  ;;  %v349_v46 = vmul.f32 %v1732_v3, %v87_v40  ;;  %v110_v40 = vld [vmem:[%s3382_s0 + $0x318] sm:$0xff] }
  0x34   :  { %v646_v55 = vsel %vm529_vm0, %v332_v49, 0.0  ;;  %v643_v59 = vadd.f32 %v642_v52, %v329_v50  ;;  %v90_v49 = vld [vmem:[%s3382_s0 + $0x278] sm:$0xff] }
  0x35   :  { %v639_v60 = vadd.f32 %v638_v53, %v327_v51  ;;  %v647_v61 = vadd.f32 %v646_v55, %v331_v54  ;;  %v94_v50 = vld [vmem:[%s3382_s0 + $0x298] sm:$0xff]  ;;  %v91_v54 = vld [vmem:[%s3382_s0 + $0x280] sm:$0xff]  ;;  %v354_v55 = vmul.f32 %v1734_v4, %v92_v48  ;;  %v352_v57 = vmul.f32 %v1734_v4, %v90_v49  ;;  %v109_v49 = vld [vmem:[%s3382_s0 + $0x310] sm:$0xff] }
  0x37   :  { %v686_v63 = vsel %vm529_vm0, %v352_v57, 0.0 }
  0x3a   :  { %608 = vadd.xlane.f32.xlu1 %v607_v5  ;;  %604 = vadd.xlane.f32.xlu0 %v603_v6  ;;  %v338_v5 = vmul.f32 %v1734_v4, %v76_v58  ;;  %v335_v6 = vmul.f32 %v1732_v3, %v73_v62  ;;  %v93_v58 = vld [vmem:[%s3382_s0 + $0x290] sm:$0xff]  ;;  %v690_v62 = vsel %vm529_vm0, %v354_v55, 0.0  ;;  %v371_v55 = vmul.f32 %v1732_v3, %v109_v49 }
  0x3b   :  { %612 = vadd.xlane.f32.xlu2 %v611_v7  ;;  %v333_v7 = vmul.f32 %v1732_v3, %v71_v0  ;;  %v355_v0 = vmul.f32 %v1732_v3, %v93_v58 }
  0x3c   :  { %v658_v11 = vsel %vm529_vm0, %v338_v5, 0.0  ;;  %v655_v15 = vadd.f32 %v654_v8, %v335_v6  ;;  %v96_v5 = vld [vmem:[%s3382_s0 + $0x2a8] sm:$0xff] }
  0x3d   :  { %v651_v16 = vadd.f32 %v650_v9, %v333_v7  ;;  %v659_v17 = vadd.f32 %v658_v11, %v337_v10  ;;  %v100_v6 = vld [vmem:[%s3382_s0 + $0x2c8] sm:$0xff]  ;;  %v97_v10 = vld [vmem:[%s3382_s0 + $0x2b0] sm:$0xff]  ;;  %v360_v11 = vmul.f32 %v1734_v4, %v98_v2  ;;  %v358_v13 = vmul.f32 %v1734_v4, %v96_v5  ;;  %v118_v2 = vld [vmem:[%s3382_s0 + $0x358] sm:$0xff] }
  0x3f   :  { %v698_v19 = vsel %vm529_vm0, %v358_v13, 0.0  ;;  %v113_v13 = vld [vmem:[%s3382_s0 + $0x330] sm:$0xff] }
  0x42   :  { %620 = vadd.xlane.f32.xlu1 %v619_v23  ;;  %616 = vadd.xlane.f32.xlu0 %v615_v24  ;;  %v344_v23 = vmul.f32 %v1734_v4, %v82_v14  ;;  %v341_v24 = vmul.f32 %v1732_v3, %v79_v18  ;;  %v99_v14 = vld [vmem:[%s3382_s0 + $0x2c0] sm:$0xff]  ;;  %v702_v18 = vsel %vm529_vm0, %v360_v11, 0.0 }
  0x43   :  { %624 = vadd.xlane.f32.xlu2 %v623_v25  ;;  %v339_v25 = vmul.f32 %v1732_v3, %v77_v20  ;;  %v361_v20 = vmul.f32 %v1732_v3, %v99_v14  ;;  %v115_v11 = vld [vmem:[%s3382_s0 + $0x340] sm:$0xff] }
  0x44   :  { %v670_v29 = vsel %vm529_vm0, %v344_v23, 0.0  ;;  %v667_v33 = vadd.f32 %v666_v26, %v341_v24  ;;  %v102_v23 = vld [vmem:[%s3382_s0 + $0x2d8] sm:$0xff] }
  0x45   :  { %v663_v34 = vadd.f32 %v662_v27, %v339_v25  ;;  %v671_v35 = vadd.f32 %v670_v29, %v343_v28  ;;  %v106_v24 = vld [vmem:[%s3382_s0 + $0x2f8] sm:$0xff]  ;;  %v103_v28 = vld [vmem:[%s3382_s0 + $0x2e0] sm:$0xff]  ;;  %v366_v29 = vmul.f32 %v1734_v4, %v104_v22  ;;  %v364_v31 = vmul.f32 %v1734_v4, %v102_v23 }
  0x46   :  { %v122_v23 = vld [vmem:[%s3382_s0 + $0x378] sm:$0xff] }
  0x47   :  { %v710_v37 = vsel %vm529_vm0, %v364_v31, 0.0 }
  0x4a   :  { %632 = vadd.xlane.f32.xlu1 %v631_v41  ;;  %628 = vadd.xlane.f32.xlu0 %v627_v42  ;;  %v350_v41 = vmul.f32 %v1734_v4, %v88_v32  ;;  %v347_v42 = vmul.f32 %v1732_v3, %v85_v36  ;;  %v105_v32 = vld [vmem:[%s3382_s0 + $0x2f0] sm:$0xff]  ;;  %v714_v36 = vsel %vm529_vm0, %v366_v29, 0.0 }
  0x4b   :  { %636 = vadd.xlane.f32.xlu2 %v635_v43  ;;  %v345_v43 = vmul.f32 %v1732_v3, %v83_v38  ;;  %v367_v38 = vmul.f32 %v1732_v3, %v105_v32  ;;  %v121_v32 = vld [vmem:[%s3382_s0 + $0x370] sm:$0xff] }
  0x4c   :  { %v682_v47 = vsel %vm529_vm0, %v350_v41, 0.0  ;;  %v679_v51 = vadd.f32 %v678_v44, %v347_v42  ;;  %v108_v41 = vld [vmem:[%s3382_s0 + $0x308] sm:$0xff] }
  0x4d   :  { %v675_v52 = vadd.f32 %v674_v45, %v345_v43  ;;  %v683_v53 = vadd.f32 %v682_v47, %v349_v46  ;;  %v112_v44 = vld [vmem:[%s3382_s0 + $0x328] sm:$0xff] }
  0x52   :  { %644 = vadd.xlane.f32.xlu1 %v643_v59  ;;  %640 = vadd.xlane.f32.xlu0 %v639_v60  ;;  %v356_v59 = vmul.f32 %v1734_v4, %v94_v50  ;;  %v353_v60 = vmul.f32 %v1732_v3, %v91_v54  ;;  %v372_v50 = vmul.f32 %v1734_v4, %v110_v40 }
  0x53   :  { %648 = vadd.xlane.f32.xlu2 %v647_v61  ;;  %v351_v61 = vmul.f32 %v1732_v3, %v89_v56  ;;  %v374_v54 = vmul.f32 %v1734_v4, %v112_v44 }
  0x54   :  { %v694_v1 = vsel %vm529_vm0, %v356_v59, 0.0  ;;  %v691_v7 = vadd.f32 %v690_v62, %v353_v60  ;;  %v726_v57 = vsel %vm529_vm0, %v372_v50, 0.0  ;;  %v114_v62 = vld [vmem:[%s3382_s0 + $0x338] sm:$0xff] }
  0x55   :  { %v687_v8 = vadd.f32 %v686_v63, %v351_v61  ;;  %v695_v9 = vadd.f32 %v694_v1, %v355_v0  ;;  %v730_v60 = vsel %vm529_vm0, %v374_v54, 0.0  ;;  %v116_v61 = vld [vmem:[%s3382_s0 + $0x348] sm:$0xff]  ;;  %v376_v14 = vmul.f32 %v1734_v4, %v114_v62 }
  0x5a   :  { %656 = vadd.xlane.f32.xlu1 %v655_v15  ;;  %652 = vadd.xlane.f32.xlu0 %v651_v16  ;;  %v362_v15 = vmul.f32 %v1734_v4, %v100_v6  ;;  %v359_v16 = vmul.f32 %v1732_v3, %v97_v10  ;;  %v727_v6 = vadd.f32 %v726_v57, %v371_v55 }
  0x5b   :  { %660 = vadd.xlane.f32.xlu2 %v659_v17  ;;  %v357_v17 = vmul.f32 %v1732_v3, %v95_v12  ;;  %v378_v12 = vmul.f32 %v1734_v4, %v116_v61  ;;  %v125_v61 = vld [vmem:[%s3382_s0 + $0x390] sm:$0xff] }
  0x5c   :  { %v706_v21 = vsel %vm529_vm0, %v362_v15, 0.0  ;;  %v703_v25 = vadd.f32 %v702_v18, %v359_v16  ;;  %v117_v15 = vld [vmem:[%s3382_s0 + $0x350] sm:$0xff]  ;;  %v380_v16 = vmul.f32 %v1734_v4, %v118_v2  ;;  %v375_v18 = vmul.f32 %v1732_v3, %v113_v13  ;;  %v136_v13 = vld [vmem:[%s3382_s0 + $0x3e8] sm:$0xff] }
  0x5d   :  { %v699_v26 = vadd.f32 %v698_v19, %v357_v17  ;;  %v707_v27 = vadd.f32 %v706_v21, %v361_v20  ;;  %v377_v17 = vmul.f32 %v1732_v3, %v115_v11  ;;  %v738_v19 = vsel %vm529_vm0, %v378_v12, 0.0 }
  0x5e   :  { %v734_v20 = vsel %vm529_vm0, %v376_v14, 0.0  ;;  %v379_v21 = vmul.f32 %v1732_v3, %v117_v15  ;;  %v742_v22 = vsel %vm529_vm0, %v380_v16, 0.0  ;;  %v387_v2 = vmul.f32 %v1732_v3, %v125_v61  ;;  %v148_v61 = vld [vmem:[%s3382_s0 + $0x448] sm:$0xff] }
  0x5f   :  { %v735_v29 = vadd.f32 %v734_v20, %v375_v18  ;;  %v133_v18 = vld [vmem:[%s3382_s0 + $0x3d0] sm:$0xff]  ;;  %v131_v20 = vld [vmem:[%s3382_s0 + $0x3c0] sm:$0xff] }
  0x60   :  { %v743_v31 = vadd.f32 %v742_v22, %v379_v21 }
  0x62   :  { %668 = vadd.xlane.f32.xlu1 %v667_v33  ;;  %664 = vadd.xlane.f32.xlu0 %v663_v34  ;;  %v368_v33 = vmul.f32 %v1734_v4, %v106_v24  ;;  %v365_v34 = vmul.f32 %v1732_v3, %v103_v28  ;;  %v120_v24 = vld [vmem:[%s3382_s0 + $0x368] sm:$0xff]  ;;  %v739_v28 = vadd.f32 %v738_v19, %v377_v17 }
  0x63   :  { %672 = vadd.xlane.f32.xlu2 %v671_v35  ;;  %v363_v35 = vmul.f32 %v1732_v3, %v101_v30 }
  0x64   :  { %v718_v39 = vsel %vm529_vm0, %v368_v33, 0.0  ;;  %v715_v45 = vadd.f32 %v714_v36, %v365_v34  ;;  %v384_v33 = vmul.f32 %v1734_v4, %v122_v23  ;;  %v119_v34 = vld [vmem:[%s3382_s0 + $0x360] sm:$0xff] }
  0x65   :  { %v711_v46 = vadd.f32 %v710_v37, %v363_v35  ;;  %v719_v48 = vadd.f32 %v718_v39, %v367_v38  ;;  %v382_v35 = vmul.f32 %v1734_v4, %v120_v24  ;;  %v123_v37 = vld [vmem:[%s3382_s0 + $0x380] sm:$0xff]  ;;  %v398_v24 = vmul.f32 %v1734_v4, %v136_v13 }
  0x66   :  { %v135_v23 = vld [vmem:[%s3382_s0 + $0x3e0] sm:$0xff] }
  0x67   :  { %v746_v44 = vsel %vm529_vm0, %v382_v35, 0.0 }
  0x6a   :  { %680 = vadd.xlane.f32.xlu1 %v679_v51  ;;  %676 = vadd.xlane.f32.xlu0 %v675_v52  ;;  %v107_v51 = vld [vmem:[%s3382_s0 + $0x300] sm:$0xff]  ;;  %v370_v52 = vmul.f32 %v1734_v4, %v108_v41  ;;  %v383_v41 = vmul.f32 %v1732_v3, %v121_v32  ;;  %v778_v32 = vsel %vm529_vm0, %v398_v24, 0.0  ;;  %v154_v24 = vld [vmem:[%s3382_s0 + $0x478] sm:$0xff] }
  0x6b   :  { %684 = vadd.xlane.f32.xlu2 %v683_v53  ;;  %v111_v53 = vld [vmem:[%s3382_s0 + $0x320] sm:$0xff]  ;;  %v369_v56 = vmul.f32 %v1732_v3, %v107_v51 }
  0x6c   :  { %v722_v58 = vsel %vm529_vm0, %v370_v52, 0.0  ;;  %v373_v59 = vmul.f32 %v1732_v3, %v111_v53  ;;  %v130_v52 = vld [vmem:[%s3382_s0 + $0x3b8] sm:$0xff] }
  0x6e   :  { %v731_v10 = vadd.f32 %v730_v60, %v373_v59  ;;  %v127_v59 = vld [vmem:[%s3382_s0 + $0x3a0] sm:$0xff] }
  0x72   :  { %692 = vadd.xlane.f32.xlu1 %v691_v7  ;;  %688 = vadd.xlane.f32.xlu0 %v687_v8  ;;  %v723_v7 = vadd.f32 %v722_v58, %v369_v56 }
  0x73   :  { %696 = vadd.xlane.f32.xlu2 %v695_v9 }
  0x7a   :  { %704 = vadd.xlane.f32.xlu1 %v703_v25  ;;  %700 = vadd.xlane.f32.xlu0 %v699_v26 }
  0x7b   :  { %708 = vadd.xlane.f32.xlu2 %v707_v27  ;;  %v124_v27 = vld [vmem:[%s3382_s0 + $0x388] sm:$0xff] }
  0x7c   :  { %v386_v38 = vmul.f32 %v1734_v4, %v124_v27  ;;  %v395_v27 = vmul.f32 %v1732_v3, %v133_v18 }
  0x7d   :  { %v541_v42 = vpop.xlane.xlu1 %540  ;;  %v533_v43 = vpop.xlane.xlu0 %532 }
  0x7e   :  { %1045 = vst.msk [vmem:[#allocation2 + $0x10] sm:$0xff] %vm1042_vm1, %v541_v42  ;;  %v549_v47 = vpop.xlane.xlu2 %548  ;;  %v381_v42 = vmul.f32 %v1732_v3, %v119_v34  ;;  %v138_v34 = vld [vmem:[%s3382_s0 + $0x3f8] sm:$0xff] }
  0x7f   :  { %1043 = vst.msk [vmem:[#allocation2] sm:$0xff] %vm1042_vm1, %v533_v43  ;;  %v750_v43 = vsel %vm529_vm0, %v384_v33, 0.0  ;;  %v140_v33 = vld [vmem:[%s3382_s0 + $0x408] sm:$0xff] }
  0x80   :  { %1047 = vst.msk [vmem:[#allocation2 + $0x20] sm:$0xff] %vm1042_vm1, %v549_v47  ;;  %v128_v47 = vld [vmem:[%s3382_s0 + $0x3a8] sm:$0xff]  ;;  %v751_v54 = vadd.f32 %v750_v43, %v383_v41  ;;  %v747_v55 = vadd.f32 %v746_v44, %v381_v42 }
  0x81   :  { %v390_v60 = vmul.f32 %v1734_v4, %v128_v47  ;;  %v137_v47 = vld [vmem:[%s3382_s0 + $0x3f0] sm:$0xff] }
  0x82   :  { %716 = vadd.xlane.f32.xlu1 %v715_v45  ;;  %712 = vadd.xlane.f32.xlu0 %v711_v46  ;;  %v385_v45 = vmul.f32 %v1732_v3, %v123_v37  ;;  %v754_v46 = vsel %vm529_vm0, %v386_v38, 0.0  ;;  %v142_v38 = vld [vmem:[%s3382_s0 + $0x418] sm:$0xff] }
  0x83   :  { %720 = vadd.xlane.f32.xlu2 %v719_v48  ;;  %v126_v48 = vld [vmem:[%s3382_s0 + $0x398] sm:$0xff] }
  0x84   :  { %v755_v58 = vadd.f32 %v754_v46, %v385_v45  ;;  %v388_v62 = vmul.f32 %v1734_v4, %v126_v48  ;;  %v139_v45 = vld [vmem:[%s3382_s0 + $0x400] sm:$0xff]  ;;  %v402_v46 = vmul.f32 %v1734_v4, %v140_v33  ;;  %v400_v48 = vmul.f32 %v1734_v4, %v138_v34  ;;  %v149_v33 = vld [vmem:[%s3382_s0 + $0x450] sm:$0xff] }
  0x85   :  { %v1453_v63 = vld [vmem:[#allocation2 + $0x10] sm:$0xff]  ;;  %v545_v0 = vpop.xlane.xlu1 %544  ;;  %v537_v1 = vpop.xlane.xlu0 %536 }
  0x86   :  { %1454 = vst [vmem:[%s3384_s2 + $0x10] sm:$0xff] %v1453_v63  ;;  %v1449_v5 = vld [vmem:[#allocation2] sm:$0xff]  ;;  %v553_v8 = vpop.xlane.xlu2 %552  ;;  %v129_v63 = vld [vmem:[%s3382_s0 + $0x3b0] sm:$0xff] }
  0x87   :  { %1450 = vst [vmem:[%s3384_s2] sm:$0xff] %v1449_v5  ;;  %v1457_v9 = vld [vmem:[#allocation2 + $0x20] sm:$0xff]  ;;  %v762_v5 = vsel %vm529_vm0, %v390_v60, 0.0 }
  0x88   :  { %1458 = vst [vmem:[%s3384_s2 + $0x20] sm:$0xff] %v1457_v9  ;;  %v134_v9 = vld [vmem:[%s3382_s0 + $0x3d8] sm:$0xff] }
  0x89   :  { %1046 = vst.msk [vmem:[#allocation2 + $0x18] sm:$0xff] %vm1042_vm1, %v545_v0  ;;  %v392_v0 = vmul.f32 %v1734_v4, %v130_v52  ;;  %v396_v19 = vmul.f32 %v1734_v4, %v134_v9  ;;  %v399_v52 = vmul.f32 %v1732_v3, %v137_v47  ;;  %v147_v9 = vld [vmem:[%s3382_s0 + $0x440] sm:$0xff]  ;;  %v160_v47 = vld [vmem:[%s3382_s0 + $0x4a8] sm:$0xff] }
  0x8a   :  { %1044 = vst.msk [vmem:[#allocation2 + $0x8] sm:$0xff] %vm1042_vm1, %v537_v1  ;;  %728 = vadd.xlane.f32.xlu1 %v727_v6  ;;  %724 = vadd.xlane.f32.xlu0 %v723_v7  ;;  %v389_v1 = vmul.f32 %v1732_v3, %v127_v59  ;;  %v758_v6 = vsel %vm529_vm0, %v388_v62, 0.0  ;;  %v391_v7 = vmul.f32 %v1732_v3, %v129_v63 }
  0x8b   :  { %1048 = vst.msk [vmem:[#allocation2 + $0x28] sm:$0xff] %vm1042_vm1, %v553_v8  ;;  %732 = vadd.xlane.f32.xlu2 %v731_v10  ;;  %v766_v8 = vsel %vm529_vm0, %v392_v0, 0.0  ;;  %v132_v10 = vld [vmem:[%s3382_s0 + $0x3c8] sm:$0xff]  ;;  %v759_v15 = vadd.f32 %v758_v6, %v387_v2  ;;  %v145_v2 = vld [vmem:[%s3382_s0 + $0x430] sm:$0xff]  ;;  %v143_v6 = vld [vmem:[%s3382_s0 + $0x420] sm:$0xff] }
  0x8c   :  { %v763_v14 = vadd.f32 %v762_v5, %v389_v1  ;;  %v767_v17 = vadd.f32 %v766_v8, %v391_v7  ;;  %v394_v21 = vmul.f32 %v1734_v4, %v132_v10  ;;  %v410_v10 = vmul.f32 %v1734_v4, %v148_v61 }
  0x8d   :  { %v561_v25 = vpop.xlane.xlu1 %560  ;;  %v557_v26 = vpop.xlane.xlu0 %556  ;;  %v407_v13 = vmul.f32 %v1732_v3, %v145_v2 }
  0x8e   :  { %1050 = vst.msk [vmem:[#allocation2 + $0x38] sm:$0xff] %vm1042_vm1, %v561_v25  ;;  %v565_v30 = vpop.xlane.xlu2 %564  ;;  %v802_v18 = vsel %vm529_vm0, %v410_v10, 0.0  ;;  %v166_v10 = vld [vmem:[%s3382_s0 + $0x4d8] sm:$0xff] }
  0x8f   :  { %1049 = vst.msk [vmem:[#allocation2 + $0x30] sm:$0xff] %vm1042_vm1, %v557_v26 }
  0x90   :  { %v1455_v36 = vld [vmem:[#allocation2 + $0x18] sm:$0xff]  ;;  %1051 = vst.msk [vmem:[#allocation2 + $0x40] sm:$0xff] %vm1042_vm1, %v565_v30  ;;  %v770_v30 = vsel %vm529_vm0, %v394_v21, 0.0 }
  0x91   :  { %1456 = vst [vmem:[%s3384_s2 + $0x18] sm:$0xff] %v1455_v36  ;;  %v1451_v39 = vld [vmem:[#allocation2 + $0x8] sm:$0xff] }
  0x92   :  { %1452 = vst [vmem:[%s3384_s2 + $0x8] sm:$0xff] %v1451_v39  ;;  %v1459_v40 = vld [vmem:[#allocation2 + $0x28] sm:$0xff]  ;;  %740 = vadd.xlane.f32.xlu1 %v739_v28  ;;  %736 = vadd.xlane.f32.xlu0 %v735_v29  ;;  %v393_v28 = vmul.f32 %v1732_v3, %v131_v20  ;;  %v774_v29 = vsel %vm529_vm0, %v396_v19, 0.0  ;;  %v150_v20 = vld [vmem:[%s3382_s0 + $0x458] sm:$0xff] }
  0x93   :  { %1460 = vst [vmem:[%s3384_s2 + $0x28] sm:$0xff] %v1459_v40  ;;  %744 = vadd.xlane.f32.xlu2 %v743_v31  ;;  %v397_v31 = vmul.f32 %v1732_v3, %v135_v23  ;;  %v775_v40 = vadd.f32 %v774_v29, %v395_v27  ;;  %v152_v19 = vld [vmem:[%s3382_s0 + $0x468] sm:$0xff]  ;;  %v412_v34 = vmul.f32 %v1734_v4, %v150_v20 }
  0x94   :  { %v771_v41 = vadd.f32 %v770_v30, %v393_v28 }
  0x95   :  { %v1463_v49 = vld [vmem:[#allocation2 + $0x38] sm:$0xff]  ;;  %v573_v50 = vpop.xlane.xlu1 %572  ;;  %v569_v51 = vpop.xlane.xlu0 %568  ;;  %v779_v44 = vadd.f32 %v778_v32, %v397_v31  ;;  %v151_v31 = vld [vmem:[%s3382_s0 + $0x460] sm:$0xff]  ;;  %v414_v32 = vmul.f32 %v1734_v4, %v152_v19  ;;  %v161_v19 = vld [vmem:[%s3382_s0 + $0x4b0] sm:$0xff] }
  0x96   :  { %1464 = vst [vmem:[%s3384_s2 + $0x38] sm:$0xff] %v1463_v49  ;;  %v1461_v53 = vld [vmem:[#allocation2 + $0x30] sm:$0xff]  ;;  %v577_v56 = vpop.xlane.xlu2 %576 }
  0x97   :  { %1462 = vst [vmem:[%s3384_s2 + $0x30] sm:$0xff] %v1461_v53  ;;  %v1465_v57 = vld [vmem:[#allocation2 + $0x40] sm:$0xff]  ;;  %v141_v49 = vld [vmem:[%s3382_s0 + $0x410] sm:$0xff]  ;;  %v786_v53 = vsel %vm529_vm0, %v402_v46, 0.0 }
  0x98   :  { %1466 = vst [vmem:[%s3384_s2 + $0x40] sm:$0xff] %v1465_v57  ;;  %v146_v57 = vld [vmem:[%s3382_s0 + $0x438] sm:$0xff] }
  0x99   :  { %1053 = vst.msk [vmem:[#allocation2 + $0x50] sm:$0xff] %vm1042_vm1, %v573_v50  ;;  %v404_v50 = vmul.f32 %v1734_v4, %v142_v38  ;;  %v408_v5 = vmul.f32 %v1734_v4, %v146_v57  ;;  %v411_v38 = vmul.f32 %v1732_v3, %v149_v33  ;;  %v159_v57 = vld [vmem:[%s3382_s0 + $0x4a0] sm:$0xff]  ;;  %v172_v33 = vld [vmem:[%s3382_s0 + $0x508] sm:$0xff] }
  0x9a   :  { %1052 = vst.msk [vmem:[#allocation2 + $0x48] sm:$0xff] %vm1042_vm1, %v569_v51  ;;  %752 = vadd.xlane.f32.xlu1 %v751_v54  ;;  %748 = vadd.xlane.f32.xlu0 %v747_v55  ;;  %v401_v51 = vmul.f32 %v1732_v3, %v139_v45  ;;  %v782_v54 = vsel %vm529_vm0, %v400_v48, 0.0  ;;  %v403_v55 = vmul.f32 %v1732_v3, %v141_v49 }
  0x9b   :  { %1054 = vst.msk [vmem:[#allocation2 + $0x58] sm:$0xff] %vm1042_vm1, %v577_v56  ;;  %756 = vadd.xlane.f32.xlu2 %v755_v58  ;;  %v790_v56 = vsel %vm529_vm0, %v404_v50, 0.0  ;;  %v144_v58 = vld [vmem:[%s3382_s0 + $0x428] sm:$0xff]  ;;  %v783_v63 = vadd.f32 %v782_v54, %v399_v52  ;;  %v157_v52 = vld [vmem:[%s3382_s0 + $0x490] sm:$0xff]  ;;  %v155_v54 = vld [vmem:[%s3382_s0 + $0x480] sm:$0xff] }
  0x9c   :  { %v787_v62 = vadd.f32 %v786_v53, %v401_v51  ;;  %v791_v1 = vadd.f32 %v790_v56, %v403_v55  ;;  %v406_v7 = vmul.f32 %v1734_v4, %v144_v58  ;;  %v422_v58 = vmul.f32 %v1734_v4, %v160_v47 }
  0x9d   :  { %v585_v11 = vpop.xlane.xlu1 %584  ;;  %v581_v12 = vpop.xlane.xlu0 %580  ;;  %v419_v61 = vmul.f32 %v1732_v3, %v157_v52 }
  0x9e   :  { %1056 = vst.msk [vmem:[#allocation2 + $0x68] sm:$0xff] %vm1042_vm1, %v585_v11  ;;  %v589_v16 = vpop.xlane.xlu2 %588  ;;  %v826_v2 = vsel %vm529_vm0, %v422_v58, 0.0  ;;  %v178_v58 = vld [vmem:[%s3382_s0 + $0x538] sm:$0xff] }
  0x9f   :  { %1055 = vst.msk [vmem:[#allocation2 + $0x60] sm:$0xff] %vm1042_vm1, %v581_v12 }
  0xa0   :  { %v1469_v22 = vld [vmem:[#allocation2 + $0x50] sm:$0xff]  ;;  %1057 = vst.msk [vmem:[#allocation2 + $0x70] sm:$0xff] %vm1042_vm1, %v589_v16  ;;  %v794_v16 = vsel %vm529_vm0, %v406_v7, 0.0 }
  0xa1   :  { %1470 = vst [vmem:[%s3384_s2 + $0x50] sm:$0xff] %v1469_v22  ;;  %v1467_v25 = vld [vmem:[#allocation2 + $0x48] sm:$0xff] }
  0xa2   :  { %1468 = vst [vmem:[%s3384_s2 + $0x48] sm:$0xff] %v1467_v25  ;;  %v1471_v26 = vld [vmem:[#allocation2 + $0x58] sm:$0xff]  ;;  %764 = vadd.xlane.f32.xlu1 %v763_v14  ;;  %760 = vadd.xlane.f32.xlu0 %v759_v15  ;;  %v405_v14 = vmul.f32 %v1732_v3, %v143_v6  ;;  %v798_v15 = vsel %vm529_vm0, %v408_v5, 0.0  ;;  %v164_v5 = vld [vmem:[%s3382_s0 + $0x4c8] sm:$0xff] }
  0xa3   :  { %1472 = vst [vmem:[%s3384_s2 + $0x58] sm:$0xff] %v1471_v26  ;;  %768 = vadd.xlane.f32.xlu2 %v767_v17  ;;  %v409_v17 = vmul.f32 %v1732_v3, %v147_v9  ;;  %v799_v26 = vadd.f32 %v798_v15, %v407_v13  ;;  %v162_v6 = vld [vmem:[%s3382_s0 + $0x4b8] sm:$0xff] }
  0xa4   :  { %v795_v27 = vadd.f32 %v794_v16, %v405_v14  ;;  %v424_v20 = vmul.f32 %v1734_v4, %v162_v6 }
  0xa5   :  { %v1475_v35 = vld [vmem:[#allocation2 + $0x68] sm:$0xff]  ;;  %v597_v36 = vpop.xlane.xlu1 %596  ;;  %v593_v37 = vpop.xlane.xlu0 %592  ;;  %v803_v30 = vadd.f32 %v802_v18, %v409_v17  ;;  %v163_v17 = vld [vmem:[%s3382_s0 + $0x4c0] sm:$0xff]  ;;  %v426_v18 = vmul.f32 %v1734_v4, %v164_v5  ;;  %v173_v5 = vld [vmem:[%s3382_s0 + $0x510] sm:$0xff] }
  0xa6   :  { %1476 = vst [vmem:[%s3384_s2 + $0x68] sm:$0xff] %v1475_v35  ;;  %v1473_v39 = vld [vmem:[#allocation2 + $0x60] sm:$0xff]  ;;  %v601_v42 = vpop.xlane.xlu2 %600  ;;  %v153_v35 = vld [vmem:[%s3382_s0 + $0x470] sm:$0xff] }
  0xa7   :  { %1474 = vst [vmem:[%s3384_s2 + $0x60] sm:$0xff] %v1473_v39  ;;  %v1477_v43 = vld [vmem:[#allocation2 + $0x70] sm:$0xff]  ;;  %v810_v39 = vsel %vm529_vm0, %v414_v32, 0.0 }
  0xa8   :  { %1478 = vst [vmem:[%s3384_s2 + $0x70] sm:$0xff] %v1477_v43  ;;  %v158_v43 = vld [vmem:[%s3382_s0 + $0x498] sm:$0xff] }
  0xa9   :  { %1059 = vst.msk [vmem:[#allocation2 + $0x80] sm:$0xff] %vm1042_vm1, %v597_v36  ;;  %v416_v36 = vmul.f32 %v1734_v4, %v154_v24  ;;  %v420_v53 = vmul.f32 %v1734_v4, %v158_v43  ;;  %v423_v24 = vmul.f32 %v1732_v3, %v161_v19  ;;  %v171_v43 = vld [vmem:[%s3382_s0 + $0x500] sm:$0xff]  ;;  %v184_v19 = vld [vmem:[%s3382_s0 + $0x568] sm:$0xff] }
  0xaa   :  { %1058 = vst.msk [vmem:[#allocation2 + $0x78] sm:$0xff] %vm1042_vm1, %v593_v37  ;;  %776 = vadd.xlane.f32.xlu1 %v775_v40  ;;  %772 = vadd.xlane.f32.xlu0 %v771_v41  ;;  %v413_v37 = vmul.f32 %v1732_v3, %v151_v31  ;;  %v806_v40 = vsel %vm529_vm0, %v412_v34, 0.0  ;;  %v415_v41 = vmul.f32 %v1732_v3, %v153_v35 }
  0xab   :  { %1060 = vst.msk [vmem:[#allocation2 + $0x88] sm:$0xff] %vm1042_vm1, %v601_v42  ;;  %780 = vadd.xlane.f32.xlu2 %v779_v44  ;;  %v814_v42 = vsel %vm529_vm0, %v416_v36, 0.0  ;;  %v156_v44 = vld [vmem:[%s3382_s0 + $0x488] sm:$0xff]  ;;  %v807_v49 = vadd.f32 %v806_v40, %v411_v38  ;;  %v169_v38 = vld [vmem:[%s3382_s0 + $0x4f0] sm:$0xff]  ;;  %v167_v40 = vld [vmem:[%s3382_s0 + $0x4e0] sm:$0xff] }
  0xac   :  { %v811_v48 = vadd.f32 %v810_v39, %v413_v37  ;;  %v815_v51 = vadd.f32 %v814_v42, %v415_v41  ;;  %v418_v55 = vmul.f32 %v1734_v4, %v156_v44  ;;  %v434_v44 = vmul.f32 %v1734_v4, %v172_v33 }
  0xad   :  { %v609_v59 = vpop.xlane.xlu1 %608  ;;  %v605_v60 = vpop.xlane.xlu0 %604  ;;  %v431_v47 = vmul.f32 %v1732_v3, %v169_v38 }
  0xae   :  { %1062 = vst.msk [vmem:[#allocation2 + $0x98] sm:$0xff] %vm1042_vm1, %v609_v59  ;;  %v613_v0 = vpop.xlane.xlu2 %612  ;;  %v850_v52 = vsel %vm529_vm0, %v434_v44, 0.0  ;;  %v190_v44 = vld [vmem:[%s3382_s0 + $0x598] sm:$0xff] }
  0xaf   :  { %1061 = vst.msk [vmem:[#allocation2 + $0x90] sm:$0xff] %vm1042_vm1, %v605_v60 }
  0xb0   :  { %v1481_v8 = vld [vmem:[#allocation2 + $0x80] sm:$0xff]  ;;  %1063 = vst.msk [vmem:[#allocation2 + $0xa0] sm:$0xff] %vm1042_vm1, %v613_v0  ;;  %v818_v0 = vsel %vm529_vm0, %v418_v55, 0.0 }
  0xb1   :  { %1482 = vst [vmem:[%s3384_s2 + $0x80] sm:$0xff] %v1481_v8  ;;  %v1479_v11 = vld [vmem:[#allocation2 + $0x78] sm:$0xff] }
  0xb2   :  { %1480 = vst [vmem:[%s3384_s2 + $0x78] sm:$0xff] %v1479_v11  ;;  %v1483_v12 = vld [vmem:[#allocation2 + $0x88] sm:$0xff]  ;;  %788 = vadd.xlane.f32.xlu1 %v787_v62  ;;  %784 = vadd.xlane.f32.xlu0 %v783_v63  ;;  %v417_v62 = vmul.f32 %v1732_v3, %v155_v54  ;;  %v822_v63 = vsel %vm529_vm0, %v420_v53, 0.0  ;;  %v174_v54 = vld [vmem:[%s3382_s0 + $0x518] sm:$0xff] }
  0xb3   :  { %1484 = vst [vmem:[%s3384_s2 + $0x88] sm:$0xff] %v1483_v12  ;;  %792 = vadd.xlane.f32.xlu2 %v791_v1  ;;  %v421_v1 = vmul.f32 %v1732_v3, %v159_v57  ;;  %v823_v12 = vadd.f32 %v822_v63, %v419_v61  ;;  %v176_v53 = vld [vmem:[%s3382_s0 + $0x528] sm:$0xff]  ;;  %v436_v6 = vmul.f32 %v1734_v4, %v174_v54 }
  0xb4   :  { %v819_v13 = vadd.f32 %v818_v0, %v417_v62 }
  0xb5   :  { %v1487_v21 = vld [vmem:[#allocation2 + $0x98] sm:$0xff]  ;;  %v621_v22 = vpop.xlane.xlu1 %620  ;;  %v617_v23 = vpop.xlane.xlu0 %616  ;;  %v827_v16 = vadd.f32 %v826_v2, %v421_v1  ;;  %v175_v1 = vld [vmem:[%s3382_s0 + $0x520] sm:$0xff]  ;;  %v438_v2 = vmul.f32 %v1734_v4, %v176_v53  ;;  %v185_v53 = vld [vmem:[%s3382_s0 + $0x570] sm:$0xff] }
  0xb6   :  { %1488 = vst [vmem:[%s3384_s2 + $0x98] sm:$0xff] %v1487_v21  ;;  %v1485_v25 = vld [vmem:[#allocation2 + $0x90] sm:$0xff]  ;;  %v625_v28 = vpop.xlane.xlu2 %624 }
  0xb7   :  { %1486 = vst [vmem:[%s3384_s2 + $0x90] sm:$0xff] %v1485_v25  ;;  %v1489_v29 = vld [vmem:[#allocation2 + $0xa0] sm:$0xff]  ;;  %v165_v21 = vld [vmem:[%s3382_s0 + $0x4d0] sm:$0xff]  ;;  %v834_v25 = vsel %vm529_vm0, %v426_v18, 0.0 }
  0xb8   :  { %1490 = vst [vmem:[%s3384_s2 + $0xa0] sm:$0xff] %v1489_v29  ;;  %v170_v29 = vld [vmem:[%s3382_s0 + $0x4f8] sm:$0xff] }
  0xb9   :  { %1065 = vst.msk [vmem:[#allocation2 + $0xb0] sm:$0xff] %vm1042_vm1, %v621_v22  ;;  %v428_v22 = vmul.f32 %v1734_v4, %v166_v10  ;;  %v432_v39 = vmul.f32 %v1734_v4, %v170_v29  ;;  %v435_v10 = vmul.f32 %v1732_v3, %v173_v5  ;;  %v183_v29 = vld [vmem:[%s3382_s0 + $0x560] sm:$0xff]  ;;  %v196_v5 = vld [vmem:[%s3382_s0 + $0x5c8] sm:$0xff] }
  0xba   :  { %1064 = vst.msk [vmem:[#allocation2 + $0xa8] sm:$0xff] %vm1042_vm1, %v617_v23  ;;  %800 = vadd.xlane.f32.xlu1 %v799_v26  ;;  %796 = vadd.xlane.f32.xlu0 %v795_v27  ;;  %v425_v23 = vmul.f32 %v1732_v3, %v163_v17  ;;  %v830_v26 = vsel %vm529_vm0, %v424_v20, 0.0  ;;  %v427_v27 = vmul.f32 %v1732_v3, %v165_v21 }
  0xbb   :  { %1066 = vst.msk [vmem:[#allocation2 + $0xb8] sm:$0xff] %vm1042_vm1, %v625_v28  ;;  %804 = vadd.xlane.f32.xlu2 %v803_v30  ;;  %v838_v28 = vsel %vm529_vm0, %v428_v22, 0.0  ;;  %v168_v30 = vld [vmem:[%s3382_s0 + $0x4e8] sm:$0xff]  ;;  %v831_v35 = vadd.f32 %v830_v26, %v423_v24  ;;  %v181_v24 = vld [vmem:[%s3382_s0 + $0x550] sm:$0xff]  ;;  %v179_v26 = vld [vmem:[%s3382_s0 + $0x540] sm:$0xff] }
  0xbc   :  { %v835_v34 = vadd.f32 %v834_v25, %v425_v23  ;;  %v839_v37 = vadd.f32 %v838_v28, %v427_v27  ;;  %v430_v41 = vmul.f32 %v1734_v4, %v168_v30  ;;  %v446_v30 = vmul.f32 %v1734_v4, %v184_v19 }
  0xbd   :  { %v633_v45 = vpop.xlane.xlu1 %632  ;;  %v629_v46 = vpop.xlane.xlu0 %628  ;;  %v443_v33 = vmul.f32 %v1732_v3, %v181_v24 }
  0xbe   :  { %1068 = vst.msk [vmem:[#allocation2 + $0xc8] sm:$0xff] %vm1042_vm1, %v633_v45  ;;  %v637_v50 = vpop.xlane.xlu2 %636  ;;  %v874_v38 = vsel %vm529_vm0, %v446_v30, 0.0  ;;  %v202_v30 = vld [vmem:[%s3382_s0 + $0x5f8] sm:$0xff] }
  0xbf   :  { %1067 = vst.msk [vmem:[#allocation2 + $0xc0] sm:$0xff] %vm1042_vm1, %v629_v46 }
  0xc0   :  { %v1493_v56 = vld [vmem:[#allocation2 + $0xb0] sm:$0xff]  ;;  %1069 = vst.msk [vmem:[#allocation2 + $0xd0] sm:$0xff] %vm1042_vm1, %v637_v50  ;;  %v842_v50 = vsel %vm529_vm0, %v430_v41, 0.0 }
  0xc1   :  { %1494 = vst [vmem:[%s3384_s2 + $0xb0] sm:$0xff] %v1493_v56  ;;  %v1491_v59 = vld [vmem:[#allocation2 + $0xa8] sm:$0xff] }
  0xc2   :  { %1492 = vst [vmem:[%s3384_s2 + $0xa8] sm:$0xff] %v1491_v59  ;;  %v1495_v60 = vld [vmem:[#allocation2 + $0xb8] sm:$0xff]  ;;  %812 = vadd.xlane.f32.xlu1 %v811_v48  ;;  %808 = vadd.xlane.f32.xlu0 %v807_v49  ;;  %v429_v48 = vmul.f32 %v1732_v3, %v167_v40  ;;  %v846_v49 = vsel %vm529_vm0, %v432_v39, 0.0  ;;  %v188_v39 = vld [vmem:[%s3382_s0 + $0x588] sm:$0xff] }
  0xc3   :  { %1496 = vst [vmem:[%s3384_s2 + $0xb8] sm:$0xff] %v1495_v60  ;;  %816 = vadd.xlane.f32.xlu2 %v815_v51  ;;  %v433_v51 = vmul.f32 %v1732_v3, %v171_v43  ;;  %v847_v60 = vadd.f32 %v846_v49, %v431_v47  ;;  %v186_v40 = vld [vmem:[%s3382_s0 + $0x578] sm:$0xff] }
  0xc4   :  { %v843_v61 = vadd.f32 %v842_v50, %v429_v48  ;;  %v448_v54 = vmul.f32 %v1734_v4, %v186_v40 }
  0xc5   :  { %v1499_v7 = vld [vmem:[#allocation2 + $0xc8] sm:$0xff]  ;;  %v645_v8 = vpop.xlane.xlu1 %644  ;;  %v641_v9 = vpop.xlane.xlu0 %640  ;;  %v851_v0 = vadd.f32 %v850_v52, %v433_v51  ;;  %v187_v51 = vld [vmem:[%s3382_s0 + $0x580] sm:$0xff]  ;;  %v450_v52 = vmul.f32 %v1734_v4, %v188_v39  ;;  %v197_v39 = vld [vmem:[%s3382_s0 + $0x5d0] sm:$0xff] }
  0xc6   :  { %1500 = vst [vmem:[%s3384_s2 + $0xc8] sm:$0xff] %v1499_v7  ;;  %v1497_v11 = vld [vmem:[#allocation2 + $0xc0] sm:$0xff]  ;;  %v649_v14 = vpop.xlane.xlu2 %648  ;;  %v177_v7 = vld [vmem:[%s3382_s0 + $0x530] sm:$0xff] }
  0xc7   :  { %1498 = vst [vmem:[%s3384_s2 + $0xc0] sm:$0xff] %v1497_v11  ;;  %v1501_v15 = vld [vmem:[#allocation2 + $0xd0] sm:$0xff]  ;;  %v858_v11 = vsel %vm529_vm0, %v438_v2, 0.0 }
  0xc8   :  { %1502 = vst [vmem:[%s3384_s2 + $0xd0] sm:$0xff] %v1501_v15  ;;  %v182_v15 = vld [vmem:[%s3382_s0 + $0x558] sm:$0xff] }
  0xc9   :  { %1071 = vst.msk [vmem:[#allocation2 + $0xe0] sm:$0xff] %vm1042_vm1, %v645_v8  ;;  %v440_v8 = vmul.f32 %v1734_v4, %v178_v58  ;;  %v444_v25 = vmul.f32 %v1734_v4, %v182_v15  ;;  %v447_v58 = vmul.f32 %v1732_v3, %v185_v53  ;;  %v195_v15 = vld [vmem:[%s3382_s0 + $0x5c0] sm:$0xff]  ;;  %v208_v53 = vld [vmem:[%s3382_s0 + $0x628] sm:$0xff] }
  0xca   :  { %1070 = vst.msk [vmem:[#allocation2 + $0xd8] sm:$0xff] %vm1042_vm1, %v641_v9  ;;  %824 = vadd.xlane.f32.xlu1 %v823_v12  ;;  %820 = vadd.xlane.f32.xlu0 %v819_v13  ;;  %v437_v9 = vmul.f32 %v1732_v3, %v175_v1  ;;  %v854_v12 = vsel %vm529_vm0, %v436_v6, 0.0  ;;  %v439_v13 = vmul.f32 %v1732_v3, %v177_v7 }
  0xcb   :  { %1072 = vst.msk [vmem:[#allocation2 + $0xe8] sm:$0xff] %vm1042_vm1, %v649_v14  ;;  %828 = vadd.xlane.f32.xlu2 %v827_v16  ;;  %v862_v14 = vsel %vm529_vm0, %v440_v8, 0.0  ;;  %v180_v16 = vld [vmem:[%s3382_s0 + $0x548] sm:$0xff]  ;;  %v855_v21 = vadd.f32 %v854_v12, %v435_v10  ;;  %v193_v10 = vld [vmem:[%s3382_s0 + $0x5b0] sm:$0xff]  ;;  %v191_v12 = vld [vmem:[%s3382_s0 + $0x5a0] sm:$0xff] }
  0xcc   :  { %v859_v20 = vadd.f32 %v858_v11, %v437_v9  ;;  %v863_v23 = vadd.f32 %v862_v14, %v439_v13  ;;  %v442_v27 = vmul.f32 %v1734_v4, %v180_v16  ;;  %v458_v16 = vmul.f32 %v1734_v4, %v196_v5 }
  0xcd   :  { %v657_v31 = vpop.xlane.xlu1 %656  ;;  %v653_v32 = vpop.xlane.xlu0 %652  ;;  %v455_v19 = vmul.f32 %v1732_v3, %v193_v10 }
  0xce   :  { %1074 = vst.msk [vmem:[#allocation2 + $0xf8] sm:$0xff] %vm1042_vm1, %v657_v31  ;;  %v661_v36 = vpop.xlane.xlu2 %660  ;;  %v898_v24 = vsel %vm529_vm0, %v458_v16, 0.0  ;;  %v214_v16 = vld [vmem:[%s3382_s0 + $0x658] sm:$0xff] }
  0xcf   :  { %1073 = vst.msk [vmem:[#allocation2 + $0xf0] sm:$0xff] %vm1042_vm1, %v653_v32 }
  0xd0   :  { %v1505_v42 = vld [vmem:[#allocation2 + $0xe0] sm:$0xff]  ;;  %1075 = vst.msk [vmem:[#allocation2 + $0x100] sm:$0xff] %vm1042_vm1, %v661_v36  ;;  %v866_v36 = vsel %vm529_vm0, %v442_v27, 0.0 }
  0xd1   :  { %1506 = vst [vmem:[%s3384_s2 + $0xe0] sm:$0xff] %v1505_v42  ;;  %v1503_v45 = vld [vmem:[#allocation2 + $0xd8] sm:$0xff] }
  0xd2   :  { %1504 = vst [vmem:[%s3384_s2 + $0xd8] sm:$0xff] %v1503_v45  ;;  %v1507_v46 = vld [vmem:[#allocation2 + $0xe8] sm:$0xff]  ;;  %836 = vadd.xlane.f32.xlu1 %v835_v34  ;;  %832 = vadd.xlane.f32.xlu0 %v831_v35  ;;  %v441_v34 = vmul.f32 %v1732_v3, %v179_v26  ;;  %v870_v35 = vsel %vm529_vm0, %v444_v25, 0.0  ;;  %v198_v26 = vld [vmem:[%s3382_s0 + $0x5d8] sm:$0xff] }
  0xd3   :  { %1508 = vst [vmem:[%s3384_s2 + $0xe8] sm:$0xff] %v1507_v46  ;;  %840 = vadd.xlane.f32.xlu2 %v839_v37  ;;  %v445_v37 = vmul.f32 %v1732_v3, %v183_v29  ;;  %v871_v46 = vadd.f32 %v870_v35, %v443_v33  ;;  %v200_v25 = vld [vmem:[%s3382_s0 + $0x5e8] sm:$0xff]  ;;  %v460_v40 = vmul.f32 %v1734_v4, %v198_v26 }
  0xd4   :  { %v867_v47 = vadd.f32 %v866_v36, %v441_v34 }
  0xd5   :  { %v1511_v55 = vld [vmem:[#allocation2 + $0xf8] sm:$0xff]  ;;  %v669_v56 = vpop.xlane.xlu1 %668  ;;  %v665_v57 = vpop.xlane.xlu0 %664  ;;  %v875_v50 = vadd.f32 %v874_v38, %v445_v37  ;;  %v199_v37 = vld [vmem:[%s3382_s0 + $0x5e0] sm:$0xff]  ;;  %v462_v38 = vmul.f32 %v1734_v4, %v200_v25  ;;  %v209_v25 = vld [vmem:[%s3382_s0 + $0x630] sm:$0xff] }
  0xd6   :  { %1512 = vst [vmem:[%s3384_s2 + $0xf8] sm:$0xff] %v1511_v55  ;;  %v1509_v59 = vld [vmem:[#allocation2 + $0xf0] sm:$0xff]  ;;  %v673_v62 = vpop.xlane.xlu2 %672 }
  0xd7   :  { %1510 = vst [vmem:[%s3384_s2 + $0xf0] sm:$0xff] %v1509_v59  ;;  %v1513_v63 = vld [vmem:[#allocation2 + $0x100] sm:$0xff]  ;;  %v189_v55 = vld [vmem:[%s3382_s0 + $0x590] sm:$0xff]  ;;  %v882_v59 = vsel %vm529_vm0, %v450_v52, 0.0 }
  0xd8   :  { %1514 = vst [vmem:[%s3384_s2 + $0x100] sm:$0xff] %v1513_v63  ;;  %v194_v63 = vld [vmem:[%s3382_s0 + $0x5b8] sm:$0xff] }
  0xd9   :  { %1077 = vst.msk [vmem:[#allocation2 + $0x110] sm:$0xff] %vm1042_vm1, %v669_v56  ;;  %v452_v56 = vmul.f32 %v1734_v4, %v190_v44  ;;  %v456_v11 = vmul.f32 %v1734_v4, %v194_v63  ;;  %v459_v44 = vmul.f32 %v1732_v3, %v197_v39  ;;  %v207_v63 = vld [vmem:[%s3382_s0 + $0x620] sm:$0xff]  ;;  %v220_v39 = vld [vmem:[%s3382_s0 + $0x688] sm:$0xff] }
  0xda   :  { %1076 = vst.msk [vmem:[#allocation2 + $0x108] sm:$0xff] %vm1042_vm1, %v665_v57  ;;  %848 = vadd.xlane.f32.xlu1 %v847_v60  ;;  %844 = vadd.xlane.f32.xlu0 %v843_v61  ;;  %v449_v57 = vmul.f32 %v1732_v3, %v187_v51  ;;  %v878_v60 = vsel %vm529_vm0, %v448_v54, 0.0  ;;  %v451_v61 = vmul.f32 %v1732_v3, %v189_v55 }
  0xdb   :  { %1078 = vst.msk [vmem:[#allocation2 + $0x118] sm:$0xff] %vm1042_vm1, %v673_v62  ;;  %852 = vadd.xlane.f32.xlu2 %v851_v0  ;;  %v886_v62 = vsel %vm529_vm0, %v452_v56, 0.0  ;;  %v192_v0 = vld [vmem:[%s3382_s0 + $0x5a8] sm:$0xff]  ;;  %v879_v7 = vadd.f32 %v878_v60, %v447_v58  ;;  %v205_v58 = vld [vmem:[%s3382_s0 + $0x610] sm:$0xff]  ;;  %v203_v60 = vld [vmem:[%s3382_s0 + $0x600] sm:$0xff] }
  0xdc   :  { %v883_v6 = vadd.f32 %v882_v59, %v449_v57  ;;  %v887_v9 = vadd.f32 %v886_v62, %v451_v61  ;;  %v454_v13 = vmul.f32 %v1734_v4, %v192_v0  ;;  %v470_v0 = vmul.f32 %v1734_v4, %v208_v53 }
  0xdd   :  { %v681_v17 = vpop.xlane.xlu1 %680  ;;  %v677_v18 = vpop.xlane.xlu0 %676  ;;  %v467_v5 = vmul.f32 %v1732_v3, %v205_v58 }
  0xde   :  { %1080 = vst.msk [vmem:[#allocation2 + $0x128] sm:$0xff] %vm1042_vm1, %v681_v17  ;;  %v685_v22 = vpop.xlane.xlu2 %684  ;;  %v922_v10 = vsel %vm529_vm0, %v470_v0, 0.0  ;;  %v226_v0 = vld [vmem:[%s3382_s0 + $0x6b8] sm:$0xff] }
  0xdf   :  { %1079 = vst.msk [vmem:[#allocation2 + $0x120] sm:$0xff] %vm1042_vm1, %v677_v18 }
  0xe0   :  { %v1517_v28 = vld [vmem:[#allocation2 + $0x110] sm:$0xff]  ;;  %1081 = vst.msk [vmem:[#allocation2 + $0x130] sm:$0xff] %vm1042_vm1, %v685_v22  ;;  %v890_v22 = vsel %vm529_vm0, %v454_v13, 0.0 }
  0xe1   :  { %1518 = vst [vmem:[%s3384_s2 + $0x110] sm:$0xff] %v1517_v28  ;;  %v1515_v31 = vld [vmem:[#allocation2 + $0x108] sm:$0xff] }
  0xe2   :  { %1516 = vst [vmem:[%s3384_s2 + $0x108] sm:$0xff] %v1515_v31  ;;  %v1519_v32 = vld [vmem:[#allocation2 + $0x118] sm:$0xff]  ;;  %860 = vadd.xlane.f32.xlu1 %v859_v20  ;;  %856 = vadd.xlane.f32.xlu0 %v855_v21  ;;  %v453_v20 = vmul.f32 %v1732_v3, %v191_v12  ;;  %v894_v21 = vsel %vm529_vm0, %v456_v11, 0.0  ;;  %v212_v11 = vld [vmem:[%s3382_s0 + $0x648] sm:$0xff] }
  0xe3   :  { %1520 = vst [vmem:[%s3384_s2 + $0x118] sm:$0xff] %v1519_v32  ;;  %864 = vadd.xlane.f32.xlu2 %v863_v23  ;;  %v457_v23 = vmul.f32 %v1732_v3, %v195_v15  ;;  %v895_v32 = vadd.f32 %v894_v21, %v455_v19  ;;  %v210_v12 = vld [vmem:[%s3382_s0 + $0x638] sm:$0xff] }
  0xe4   :  { %v891_v33 = vadd.f32 %v890_v22, %v453_v20  ;;  %v472_v26 = vmul.f32 %v1734_v4, %v210_v12 }
  0xe5   :  { %v1523_v41 = vld [vmem:[#allocation2 + $0x128] sm:$0xff]  ;;  %v693_v42 = vpop.xlane.xlu1 %692  ;;  %v689_v43 = vpop.xlane.xlu0 %688  ;;  %v899_v36 = vadd.f32 %v898_v24, %v457_v23  ;;  %v211_v23 = vld [vmem:[%s3382_s0 + $0x640] sm:$0xff]  ;;  %v474_v24 = vmul.f32 %v1734_v4, %v212_v11  ;;  %v221_v11 = vld [vmem:[%s3382_s0 + $0x690] sm:$0xff] }
  0xe6   :  { %1524 = vst [vmem:[%s3384_s2 + $0x128] sm:$0xff] %v1523_v41  ;;  %v1521_v45 = vld [vmem:[#allocation2 + $0x120] sm:$0xff]  ;;  %v697_v48 = vpop.xlane.xlu2 %696  ;;  %v201_v41 = vld [vmem:[%s3382_s0 + $0x5f0] sm:$0xff] }
  0xe7   :  { %1522 = vst [vmem:[%s3384_s2 + $0x120] sm:$0xff] %v1521_v45  ;;  %v1525_v49 = vld [vmem:[#allocation2 + $0x130] sm:$0xff]  ;;  %v906_v45 = vsel %vm529_vm0, %v462_v38, 0.0 }
  0xe8   :  { %1526 = vst [vmem:[%s3384_s2 + $0x130] sm:$0xff] %v1525_v49  ;;  %v206_v49 = vld [vmem:[%s3382_s0 + $0x618] sm:$0xff] }
  0xe9   :  { %1083 = vst.msk [vmem:[#allocation2 + $0x140] sm:$0xff] %vm1042_vm1, %v693_v42  ;;  %v464_v42 = vmul.f32 %v1734_v4, %v202_v30  ;;  %v468_v59 = vmul.f32 %v1734_v4, %v206_v49  ;;  %v471_v30 = vmul.f32 %v1732_v3, %v209_v25  ;;  %v219_v49 = vld [vmem:[%s3382_s0 + $0x680] sm:$0xff]  ;;  %v232_v25 = vld [vmem:[%s3382_s0 + $0x6e8] sm:$0xff] }
  0xea   :  { %1082 = vst.msk [vmem:[#allocation2 + $0x138] sm:$0xff] %vm1042_vm1, %v689_v43  ;;  %872 = vadd.xlane.f32.xlu1 %v871_v46  ;;  %868 = vadd.xlane.f32.xlu0 %v867_v47  ;;  %v461_v43 = vmul.f32 %v1732_v3, %v199_v37  ;;  %v902_v46 = vsel %vm529_vm0, %v460_v40, 0.0  ;;  %v463_v47 = vmul.f32 %v1732_v3, %v201_v41 }
  0xeb   :  { %1084 = vst.msk [vmem:[#allocation2 + $0x148] sm:$0xff] %vm1042_vm1, %v697_v48  ;;  %876 = vadd.xlane.f32.xlu2 %v875_v50  ;;  %v910_v48 = vsel %vm529_vm0, %v464_v42, 0.0  ;;  %v204_v50 = vld [vmem:[%s3382_s0 + $0x608] sm:$0xff]  ;;  %v903_v55 = vadd.f32 %v902_v46, %v459_v44  ;;  %v217_v44 = vld [vmem:[%s3382_s0 + $0x670] sm:$0xff]  ;;  %v215_v46 = vld [vmem:[%s3382_s0 + $0x660] sm:$0xff] }
  0xec   :  { %v907_v54 = vadd.f32 %v906_v45, %v461_v43  ;;  %v911_v57 = vadd.f32 %v910_v48, %v463_v47  ;;  %v466_v61 = vmul.f32 %v1734_v4, %v204_v50  ;;  %v482_v50 = vmul.f32 %v1734_v4, %v220_v39 }
  0xed   :  { %v705_v1 = vpop.xlane.xlu1 %704  ;;  %v701_v2 = vpop.xlane.xlu0 %700  ;;  %v479_v53 = vmul.f32 %v1732_v3, %v217_v44 }
  0xee   :  { %1086 = vst.msk [vmem:[#allocation2 + $0x158] sm:$0xff] %vm1042_vm1, %v705_v1  ;;  %v709_v8 = vpop.xlane.xlu2 %708  ;;  %v946_v58 = vsel %vm529_vm0, %v482_v50, 0.0  ;;  %v238_v50 = vld [vmem:[%s3382_s0 + $0x718] sm:$0xff] }
  0xef   :  { %1085 = vst.msk [vmem:[#allocation2 + $0x150] sm:$0xff] %vm1042_vm1, %v701_v2 }
  0xf0   :  { %v1529_v14 = vld [vmem:[#allocation2 + $0x140] sm:$0xff]  ;;  %1087 = vst.msk [vmem:[#allocation2 + $0x160] sm:$0xff] %vm1042_vm1, %v709_v8  ;;  %v914_v8 = vsel %vm529_vm0, %v466_v61, 0.0 }
  0xf1   :  { %1530 = vst [vmem:[%s3384_s2 + $0x140] sm:$0xff] %v1529_v14  ;;  %v1527_v17 = vld [vmem:[#allocation2 + $0x138] sm:$0xff] }
  0xf2   :  { %1528 = vst [vmem:[%s3384_s2 + $0x138] sm:$0xff] %v1527_v17  ;;  %v1531_v18 = vld [vmem:[#allocation2 + $0x148] sm:$0xff]  ;;  %884 = vadd.xlane.f32.xlu1 %v883_v6  ;;  %880 = vadd.xlane.f32.xlu0 %v879_v7  ;;  %v465_v6 = vmul.f32 %v1732_v3, %v203_v60  ;;  %v918_v7 = vsel %vm529_vm0, %v468_v59, 0.0  ;;  %v222_v60 = vld [vmem:[%s3382_s0 + $0x698] sm:$0xff] }
  0xf3   :  { %1532 = vst [vmem:[%s3384_s2 + $0x148] sm:$0xff] %v1531_v18  ;;  %888 = vadd.xlane.f32.xlu2 %v887_v9  ;;  %v469_v9 = vmul.f32 %v1732_v3, %v207_v63  ;;  %v919_v18 = vadd.f32 %v918_v7, %v467_v5  ;;  %v224_v59 = vld [vmem:[%s3382_s0 + $0x6a8] sm:$0xff]  ;;  %v484_v12 = vmul.f32 %v1734_v4, %v222_v60 }
  0xf4   :  { %v915_v19 = vadd.f32 %v914_v8, %v465_v6 }
  0xf5   :  { %v1535_v27 = vld [vmem:[#allocation2 + $0x158] sm:$0xff]  ;;  %v717_v28 = vpop.xlane.xlu1 %716  ;;  %v713_v29 = vpop.xlane.xlu0 %712  ;;  %v923_v22 = vadd.f32 %v922_v10, %v469_v9  ;;  %v223_v9 = vld [vmem:[%s3382_s0 + $0x6a0] sm:$0xff]  ;;  %v486_v10 = vmul.f32 %v1734_v4, %v224_v59  ;;  %v233_v59 = vld [vmem:[%s3382_s0 + $0x6f0] sm:$0xff] }
  0xf6   :  { %1536 = vst [vmem:[%s3384_s2 + $0x158] sm:$0xff] %v1535_v27  ;;  %v1533_v31 = vld [vmem:[#allocation2 + $0x150] sm:$0xff]  ;;  %v721_v34 = vpop.xlane.xlu2 %720 }
  0xf7   :  { %1534 = vst [vmem:[%s3384_s2 + $0x150] sm:$0xff] %v1533_v31  ;;  %v1537_v35 = vld [vmem:[#allocation2 + $0x160] sm:$0xff]  ;;  %v213_v27 = vld [vmem:[%s3382_s0 + $0x650] sm:$0xff]  ;;  %v930_v31 = vsel %vm529_vm0, %v474_v24, 0.0 }
  0xf8   :  { %1538 = vst [vmem:[%s3384_s2 + $0x160] sm:$0xff] %v1537_v35  ;;  %v218_v35 = vld [vmem:[%s3382_s0 + $0x678] sm:$0xff] }
  0xf9   :  { %1089 = vst.msk [vmem:[#allocation2 + $0x170] sm:$0xff] %vm1042_vm1, %v717_v28  ;;  %v476_v28 = vmul.f32 %v1734_v4, %v214_v16  ;;  %v480_v45 = vmul.f32 %v1734_v4, %v218_v35  ;;  %v483_v16 = vmul.f32 %v1732_v3, %v221_v11  ;;  %v231_v35 = vld [vmem:[%s3382_s0 + $0x6e0] sm:$0xff]  ;;  %v244_v11 = vld [vmem:[%s3382_s0 + $0x748] sm:$0xff] }
  0xfa   :  { %1088 = vst.msk [vmem:[#allocation2 + $0x168] sm:$0xff] %vm1042_vm1, %v713_v29  ;;  %896 = vadd.xlane.f32.xlu1 %v895_v32  ;;  %892 = vadd.xlane.f32.xlu0 %v891_v33  ;;  %v473_v29 = vmul.f32 %v1732_v3, %v211_v23  ;;  %v926_v32 = vsel %vm529_vm0, %v472_v26, 0.0  ;;  %v475_v33 = vmul.f32 %v1732_v3, %v213_v27 }
  0xfb   :  { %1090 = vst.msk [vmem:[#allocation2 + $0x178] sm:$0xff] %vm1042_vm1, %v721_v34  ;;  %900 = vadd.xlane.f32.xlu2 %v899_v36  ;;  %v934_v34 = vsel %vm529_vm0, %v476_v28, 0.0  ;;  %v216_v36 = vld [vmem:[%s3382_s0 + $0x668] sm:$0xff]  ;;  %v927_v41 = vadd.f32 %v926_v32, %v471_v30  ;;  %v229_v30 = vld [vmem:[%s3382_s0 + $0x6d0] sm:$0xff]  ;;  %v227_v32 = vld [vmem:[%s3382_s0 + $0x6c0] sm:$0xff] }
  0xfc   :  { %v931_v40 = vadd.f32 %v930_v31, %v473_v29  ;;  %v935_v43 = vadd.f32 %v934_v34, %v475_v33  ;;  %v478_v47 = vmul.f32 %v1734_v4, %v216_v36  ;;  %v494_v36 = vmul.f32 %v1734_v4, %v232_v25 }
  0xfd   :  { %v729_v51 = vpop.xlane.xlu1 %728  ;;  %v725_v52 = vpop.xlane.xlu0 %724  ;;  %v491_v39 = vmul.f32 %v1732_v3, %v229_v30 }
  0xfe   :  { %1092 = vst.msk [vmem:[#allocation2 + $0x188] sm:$0xff] %vm1042_vm1, %v729_v51  ;;  %v733_v56 = vpop.xlane.xlu2 %732  ;;  %v970_v44 = vsel %vm529_vm0, %v494_v36, 0.0  ;;  %v250_v36 = vld [vmem:[%s3382_s0 + $0x778] sm:$0xff] }
  0xff   :  { %1091 = vst.msk [vmem:[#allocation2 + $0x180] sm:$0xff] %vm1042_vm1, %v725_v52 }
 0x100   :  { %v1541_v62 = vld [vmem:[#allocation2 + $0x170] sm:$0xff]  ;;  %1093 = vst.msk [vmem:[#allocation2 + $0x190] sm:$0xff] %vm1042_vm1, %v733_v56  ;;  %v938_v56 = vsel %vm529_vm0, %v478_v47, 0.0 }
 0x101   :  { %1542 = vst [vmem:[%s3384_s2 + $0x170] sm:$0xff] %v1541_v62  ;;  %v1539_v1 = vld [vmem:[#allocation2 + $0x168] sm:$0xff] }
 0x102   :  { %1540 = vst [vmem:[%s3384_s2 + $0x168] sm:$0xff] %v1539_v1  ;;  %v1543_v2 = vld [vmem:[#allocation2 + $0x178] sm:$0xff]  ;;  %908 = vadd.xlane.f32.xlu1 %v907_v54  ;;  %904 = vadd.xlane.f32.xlu0 %v903_v55  ;;  %v477_v54 = vmul.f32 %v1732_v3, %v215_v46  ;;  %v942_v55 = vsel %vm529_vm0, %v480_v45, 0.0  ;;  %v236_v45 = vld [vmem:[%s3382_s0 + $0x708] sm:$0xff] }
 0x103   :  { %1544 = vst [vmem:[%s3384_s2 + $0x178] sm:$0xff] %v1543_v2  ;;  %912 = vadd.xlane.f32.xlu2 %v911_v57  ;;  %v481_v57 = vmul.f32 %v1732_v3, %v219_v49  ;;  %v943_v2 = vadd.f32 %v942_v55, %v479_v53  ;;  %v234_v46 = vld [vmem:[%s3382_s0 + $0x6f8] sm:$0xff] }
 0x104   :  { %v939_v5 = vadd.f32 %v938_v56, %v477_v54  ;;  %v496_v60 = vmul.f32 %v1734_v4, %v234_v46 }
 0x105   :  { %v1547_v13 = vld [vmem:[#allocation2 + $0x188] sm:$0xff]  ;;  %v741_v14 = vpop.xlane.xlu1 %740  ;;  %v737_v15 = vpop.xlane.xlu0 %736  ;;  %v947_v8 = vadd.f32 %v946_v58, %v481_v57  ;;  %v235_v57 = vld [vmem:[%s3382_s0 + $0x700] sm:$0xff]  ;;  %v498_v58 = vmul.f32 %v1734_v4, %v236_v45  ;;  %v245_v45 = vld [vmem:[%s3382_s0 + $0x750] sm:$0xff] }
 0x106   :  { %1548 = vst [vmem:[%s3384_s2 + $0x188] sm:$0xff] %v1547_v13  ;;  %v1545_v17 = vld [vmem:[#allocation2 + $0x180] sm:$0xff]  ;;  %v745_v20 = vpop.xlane.xlu2 %744  ;;  %v225_v13 = vld [vmem:[%s3382_s0 + $0x6b0] sm:$0xff] }
 0x107   :  { %1546 = vst [vmem:[%s3384_s2 + $0x180] sm:$0xff] %v1545_v17  ;;  %v1549_v21 = vld [vmem:[#allocation2 + $0x190] sm:$0xff]  ;;  %v954_v17 = vsel %vm529_vm0, %v486_v10, 0.0 }
 0x108   :  { %1550 = vst [vmem:[%s3384_s2 + $0x190] sm:$0xff] %v1549_v21  ;;  %v230_v21 = vld [vmem:[%s3382_s0 + $0x6d8] sm:$0xff] }
 0x109   :  { %1095 = vst.msk [vmem:[#allocation2 + $0x1a0] sm:$0xff] %vm1042_vm1, %v741_v14  ;;  %v488_v14 = vmul.f32 %v1734_v4, %v226_v0  ;;  %v492_v31 = vmul.f32 %v1734_v4, %v230_v21  ;;  %v495_v0 = vmul.f32 %v1732_v3, %v233_v59  ;;  %v243_v21 = vld [vmem:[%s3382_s0 + $0x740] sm:$0xff]  ;;  %v256_v59 = vld [vmem:[%s3382_s0 + $0x7a8] sm:$0xff] }
 0x10a   :  { %1094 = vst.msk [vmem:[#allocation2 + $0x198] sm:$0xff] %vm1042_vm1, %v737_v15  ;;  %920 = vadd.xlane.f32.xlu1 %v919_v18  ;;  %916 = vadd.xlane.f32.xlu0 %v915_v19  ;;  %v485_v15 = vmul.f32 %v1732_v3, %v223_v9  ;;  %v950_v18 = vsel %vm529_vm0, %v484_v12, 0.0  ;;  %v487_v19 = vmul.f32 %v1732_v3, %v225_v13 }
 0x10b   :  { %1096 = vst.msk [vmem:[#allocation2 + $0x1a8] sm:$0xff] %vm1042_vm1, %v745_v20  ;;  %924 = vadd.xlane.f32.xlu2 %v923_v22  ;;  %v958_v20 = vsel %vm529_vm0, %v488_v14, 0.0  ;;  %v228_v22 = vld [vmem:[%s3382_s0 + $0x6c8] sm:$0xff]  ;;  %v951_v27 = vadd.f32 %v950_v18, %v483_v16  ;;  %v241_v16 = vld [vmem:[%s3382_s0 + $0x730] sm:$0xff]  ;;  %v239_v18 = vld [vmem:[%s3382_s0 + $0x720] sm:$0xff] }
 0x10c   :  { %v955_v26 = vadd.f32 %v954_v17, %v485_v15  ;;  %v959_v29 = vadd.f32 %v958_v20, %v487_v19  ;;  %v490_v33 = vmul.f32 %v1734_v4, %v228_v22  ;;  %v506_v22 = vmul.f32 %v1734_v4, %v244_v11 }
 0x10d   :  { %v753_v37 = vpop.xlane.xlu1 %752  ;;  %v749_v38 = vpop.xlane.xlu0 %748  ;;  %v503_v25 = vmul.f32 %v1732_v3, %v241_v16 }
 0x10e   :  { %1098 = vst.msk [vmem:[#allocation2 + $0x1b8] sm:$0xff] %vm1042_vm1, %v753_v37  ;;  %v757_v42 = vpop.xlane.xlu2 %756  ;;  %v994_v30 = vsel %vm529_vm0, %v506_v22, 0.0  ;;  %v262_v22 = vld [vmem:[%s3382_s0 + $0x7d8] sm:$0xff] }
 0x10f   :  { %1097 = vst.msk [vmem:[#allocation2 + $0x1b0] sm:$0xff] %vm1042_vm1, %v749_v38 }
 0x110   :  { %v1553_v48 = vld [vmem:[#allocation2 + $0x1a0] sm:$0xff]  ;;  %1099 = vst.msk [vmem:[#allocation2 + $0x1c0] sm:$0xff] %vm1042_vm1, %v757_v42  ;;  %v962_v42 = vsel %vm529_vm0, %v490_v33, 0.0 }
 0x111   :  { %1554 = vst [vmem:[%s3384_s2 + $0x1a0] sm:$0xff] %v1553_v48  ;;  %v1551_v51 = vld [vmem:[#allocation2 + $0x198] sm:$0xff] }
 0x112   :  { %1552 = vst [vmem:[%s3384_s2 + $0x198] sm:$0xff] %v1551_v51  ;;  %v1555_v52 = vld [vmem:[#allocation2 + $0x1a8] sm:$0xff]  ;;  %932 = vadd.xlane.f32.xlu1 %v931_v40  ;;  %928 = vadd.xlane.f32.xlu0 %v927_v41  ;;  %v489_v40 = vmul.f32 %v1732_v3, %v227_v32  ;;  %v966_v41 = vsel %vm529_vm0, %v492_v31, 0.0  ;;  %v246_v32 = vld [vmem:[%s3382_s0 + $0x758] sm:$0xff] }
 0x113   :  { %1556 = vst [vmem:[%s3384_s2 + $0x1a8] sm:$0xff] %v1555_v52  ;;  %936 = vadd.xlane.f32.xlu2 %v935_v43  ;;  %v493_v43 = vmul.f32 %v1732_v3, %v231_v35  ;;  %v967_v52 = vadd.f32 %v966_v41, %v491_v39  ;;  %v248_v31 = vld [vmem:[%s3382_s0 + $0x768] sm:$0xff]  ;;  %v508_v46 = vmul.f32 %v1734_v4, %v246_v32 }
 0x114   :  { %v963_v53 = vadd.f32 %v962_v42, %v489_v40 }
 0x115   :  { %v1559_v61 = vld [vmem:[#allocation2 + $0x1b8] sm:$0xff]  ;;  %v765_v62 = vpop.xlane.xlu1 %764  ;;  %v761_v63 = vpop.xlane.xlu0 %760  ;;  %v971_v56 = vadd.f32 %v970_v44, %v493_v43  ;;  %v247_v43 = vld [vmem:[%s3382_s0 + $0x760] sm:$0xff]  ;;  %v510_v44 = vmul.f32 %v1734_v4, %v248_v31  ;;  %v257_v31 = vld [vmem:[%s3382_s0 + $0x7b0] sm:$0xff] }
 0x116   :  { %1560 = vst [vmem:[%s3384_s2 + $0x1b8] sm:$0xff] %v1559_v61  ;;  %v1557_v1 = vld [vmem:[#allocation2 + $0x1b0] sm:$0xff]  ;;  %v769_v6 = vpop.xlane.xlu2 %768 }
 0x117   :  { %1558 = vst [vmem:[%s3384_s2 + $0x1b0] sm:$0xff] %v1557_v1  ;;  %v1561_v7 = vld [vmem:[#allocation2 + $0x1c0] sm:$0xff]  ;;  %v237_v61 = vld [vmem:[%s3382_s0 + $0x710] sm:$0xff]  ;;  %v978_v1 = vsel %vm529_vm0, %v498_v58, 0.0 }
 0x118   :  { %1562 = vst [vmem:[%s3384_s2 + $0x1c0] sm:$0xff] %v1561_v7  ;;  %v242_v7 = vld [vmem:[%s3382_s0 + $0x738] sm:$0xff] }
 0x119   :  { %1101 = vst.msk [vmem:[#allocation2 + $0x1d0] sm:$0xff] %vm1042_vm1, %v765_v62  ;;  %v500_v62 = vmul.f32 %v1734_v4, %v238_v50  ;;  %v504_v17 = vmul.f32 %v1734_v4, %v242_v7  ;;  %v507_v50 = vmul.f32 %v1732_v3, %v245_v45  ;;  %v255_v7 = vld [vmem:[%s3382_s0 + $0x7a0] sm:$0xff] }
 0x11a   :  { %1100 = vst.msk [vmem:[#allocation2 + $0x1c8] sm:$0xff] %vm1042_vm1, %v761_v63  ;;  %944 = vadd.xlane.f32.xlu1 %v943_v2  ;;  %940 = vadd.xlane.f32.xlu0 %v939_v5  ;;  %v497_v63 = vmul.f32 %v1732_v3, %v235_v57  ;;  %v974_v2 = vsel %vm529_vm0, %v496_v60, 0.0  ;;  %v499_v5 = vmul.f32 %v1732_v3, %v237_v61 }
 0x11b   :  { %1102 = vst.msk [vmem:[#allocation2 + $0x1d8] sm:$0xff] %vm1042_vm1, %v769_v6  ;;  %948 = vadd.xlane.f32.xlu2 %v947_v8  ;;  %v982_v6 = vsel %vm529_vm0, %v500_v62, 0.0  ;;  %v240_v8 = vld [vmem:[%s3382_s0 + $0x728] sm:$0xff]  ;;  %v975_v13 = vadd.f32 %v974_v2, %v495_v0  ;;  %v253_v0 = vld [vmem:[%s3382_s0 + $0x790] sm:$0xff]  ;;  %v251_v2 = vld [vmem:[%s3382_s0 + $0x780] sm:$0xff] }
 0x11c   :  { %v979_v12 = vadd.f32 %v978_v1, %v497_v63  ;;  %v983_v15 = vadd.f32 %v982_v6, %v499_v5  ;;  %v502_v19 = vmul.f32 %v1734_v4, %v240_v8  ;;  %v518_v8 = vmul.f32 %v1734_v4, %v256_v59 }
 0x11d   :  { %v777_v23 = vpop.xlane.xlu1 %776  ;;  %v773_v24 = vpop.xlane.xlu0 %772  ;;  %v515_v11 = vmul.f32 %v1732_v3, %v253_v0 }
 0x11e   :  { %1104 = vst.msk [vmem:[#allocation2 + $0x1e8] sm:$0xff] %vm1042_vm1, %v777_v23  ;;  %v781_v28 = vpop.xlane.xlu2 %780  ;;  %v1018_v16 = vsel %vm529_vm0, %v518_v8, 0.0 }
 0x11f   :  { %1103 = vst.msk [vmem:[#allocation2 + $0x1e0] sm:$0xff] %vm1042_vm1, %v773_v24 }
 0x120   :  { %v1565_v34 = vld [vmem:[#allocation2 + $0x1d0] sm:$0xff]  ;;  %1105 = vst.msk [vmem:[#allocation2 + $0x1f0] sm:$0xff] %vm1042_vm1, %v781_v28  ;;  %v986_v28 = vsel %vm529_vm0, %v502_v19, 0.0 }
 0x121   :  { %1566 = vst [vmem:[%s3384_s2 + $0x1d0] sm:$0xff] %v1565_v34  ;;  %v1563_v37 = vld [vmem:[#allocation2 + $0x1c8] sm:$0xff] }
 0x122   :  { %1564 = vst [vmem:[%s3384_s2 + $0x1c8] sm:$0xff] %v1563_v37  ;;  %v1567_v38 = vld [vmem:[#allocation2 + $0x1d8] sm:$0xff]  ;;  %956 = vadd.xlane.f32.xlu1 %v955_v26  ;;  %952 = vadd.xlane.f32.xlu0 %v951_v27  ;;  %v501_v26 = vmul.f32 %v1732_v3, %v239_v18  ;;  %v990_v27 = vsel %vm529_vm0, %v504_v17, 0.0  ;;  %v260_v17 = vld [vmem:[%s3382_s0 + $0x7c8] sm:$0xff] }
 0x123   :  { %1568 = vst [vmem:[%s3384_s2 + $0x1d8] sm:$0xff] %v1567_v38  ;;  %960 = vadd.xlane.f32.xlu2 %v959_v29  ;;  %v505_v29 = vmul.f32 %v1732_v3, %v243_v21  ;;  %v991_v38 = vadd.f32 %v990_v27, %v503_v25  ;;  %v258_v18 = vld [vmem:[%s3382_s0 + $0x7b8] sm:$0xff] }
 0x124   :  { %v987_v39 = vadd.f32 %v986_v28, %v501_v26  ;;  %v520_v32 = vmul.f32 %v1734_v4, %v258_v18 }
 0x125   :  { %v1571_v47 = vld [vmem:[#allocation2 + $0x1e8] sm:$0xff]  ;;  %v789_v48 = vpop.xlane.xlu1 %788  ;;  %v785_v49 = vpop.xlane.xlu0 %784  ;;  %v995_v42 = vadd.f32 %v994_v30, %v505_v29  ;;  %v259_v29 = vld [vmem:[%s3382_s0 + $0x7c0] sm:$0xff]  ;;  %v522_v30 = vmul.f32 %v1734_v4, %v260_v17 }
 0x126   :  { %1572 = vst [vmem:[%s3384_s2 + $0x1e8] sm:$0xff] %v1571_v47  ;;  %v1569_v51 = vld [vmem:[#allocation2 + $0x1e0] sm:$0xff]  ;;  %v793_v54 = vpop.xlane.xlu2 %792  ;;  %v249_v47 = vld [vmem:[%s3382_s0 + $0x770] sm:$0xff] }
 0x127   :  { %1570 = vst [vmem:[%s3384_s2 + $0x1e0] sm:$0xff] %v1569_v51  ;;  %v1573_v55 = vld [vmem:[#allocation2 + $0x1f0] sm:$0xff]  ;;  %v1002_v51 = vsel %vm529_vm0, %v510_v44, 0.0 }
 0x128   :  { %1574 = vst [vmem:[%s3384_s2 + $0x1f0] sm:$0xff] %v1573_v55  ;;  %v254_v55 = vld [vmem:[%s3382_s0 + $0x798] sm:$0xff] }
 0x129   :  { %1107 = vst.msk [vmem:[#allocation2 + $0x200] sm:$0xff] %vm1042_vm1, %v789_v48  ;;  %v512_v48 = vmul.f32 %v1734_v4, %v250_v36  ;;  %v516_v1 = vmul.f32 %v1734_v4, %v254_v55  ;;  %v519_v36 = vmul.f32 %v1732_v3, %v257_v31 }
 0x12a   :  { %1106 = vst.msk [vmem:[#allocation2 + $0x1f8] sm:$0xff] %vm1042_vm1, %v785_v49  ;;  %968 = vadd.xlane.f32.xlu1 %v967_v52  ;;  %964 = vadd.xlane.f32.xlu0 %v963_v53  ;;  %v509_v49 = vmul.f32 %v1732_v3, %v247_v43  ;;  %v998_v52 = vsel %vm529_vm0, %v508_v46, 0.0  ;;  %v511_v53 = vmul.f32 %v1732_v3, %v249_v47 }
 0x12b   :  { %1108 = vst.msk [vmem:[#allocation2 + $0x208] sm:$0xff] %vm1042_vm1, %v793_v54  ;;  %972 = vadd.xlane.f32.xlu2 %v971_v56  ;;  %v1006_v54 = vsel %vm529_vm0, %v512_v48, 0.0  ;;  %v252_v56 = vld [vmem:[%s3382_s0 + $0x788] sm:$0xff]  ;;  %v999_v61 = vadd.f32 %v998_v52, %v507_v50 }
 0x12c   :  { %v1003_v60 = vadd.f32 %v1002_v51, %v509_v49  ;;  %v1007_v63 = vadd.f32 %v1006_v54, %v511_v53  ;;  %v514_v5 = vmul.f32 %v1734_v4, %v252_v56  ;;  %v265_v49 = vld [vmem:[%s3382_s0 + $0x7f0] sm:$0xff]  ;;  %v263_v51 = vld [vmem:[%s3382_s0 + $0x7e0] sm:$0xff] }
 0x12d   :  { %v801_v9 = vpop.xlane.xlu1 %800  ;;  %v797_v10 = vpop.xlane.xlu0 %796  ;;  %v527_v56 = vmul.f32 %v1732_v3, %v265_v49 }
 0x12e   :  { %1110 = vst.msk [vmem:[#allocation2 + $0x218] sm:$0xff] %vm1042_vm1, %v801_v9  ;;  %v805_v14 = vpop.xlane.xlu2 %804 }
 0x12f   :  { %1109 = vst.msk [vmem:[#allocation2 + $0x210] sm:$0xff] %vm1042_vm1, %v797_v10 }
 0x130   :  { %v1577_v20 = vld [vmem:[#allocation2 + $0x200] sm:$0xff]  ;;  %1111 = vst.msk [vmem:[#allocation2 + $0x220] sm:$0xff] %vm1042_vm1, %v805_v14  ;;  %v1010_v14 = vsel %vm529_vm0, %v514_v5, 0.0 }
 0x131   :  { %1578 = vst [vmem:[%s3384_s2 + $0x200] sm:$0xff] %v1577_v20  ;;  %v1575_v23 = vld [vmem:[#allocation2 + $0x1f8] sm:$0xff] }
 0x132   :  { %1576 = vst [vmem:[%s3384_s2 + $0x1f8] sm:$0xff] %v1575_v23  ;;  %v1579_v24 = vld [vmem:[#allocation2 + $0x208] sm:$0xff]  ;;  %980 = vadd.xlane.f32.xlu1 %v979_v12  ;;  %976 = vadd.xlane.f32.xlu0 %v975_v13  ;;  %v513_v12 = vmul.f32 %v1732_v3, %v251_v2  ;;  %v1014_v13 = vsel %vm529_vm0, %v516_v1, 0.0 }
 0x133   :  { %1580 = vst [vmem:[%s3384_s2 + $0x208] sm:$0xff] %v1579_v24  ;;  %984 = vadd.xlane.f32.xlu2 %v983_v15  ;;  %v517_v15 = vmul.f32 %v1732_v3, %v255_v7  ;;  %v1015_v24 = vadd.f32 %v1014_v13, %v515_v11 }
 0x134   :  { %v1011_v25 = vadd.f32 %v1010_v14, %v513_v12 }
 0x135   :  { %v1583_v33 = vld [vmem:[#allocation2 + $0x218] sm:$0xff]  ;;  %v813_v34 = vpop.xlane.xlu1 %812  ;;  %v809_v35 = vpop.xlane.xlu0 %808  ;;  %v1019_v28 = vadd.f32 %v1018_v16, %v517_v15 }
 0x136   :  { %1584 = vst [vmem:[%s3384_s2 + $0x218] sm:$0xff] %v1583_v33  ;;  %v1581_v37 = vld [vmem:[#allocation2 + $0x210] sm:$0xff]  ;;  %v817_v40 = vpop.xlane.xlu2 %816 }
 0x137   :  { %1582 = vst [vmem:[%s3384_s2 + $0x210] sm:$0xff] %v1581_v37  ;;  %v1585_v41 = vld [vmem:[#allocation2 + $0x220] sm:$0xff]  ;;  %v261_v33 = vld [vmem:[%s3382_s0 + $0x7d0] sm:$0xff]  ;;  %v1026_v37 = vsel %vm529_vm0, %v522_v30, 0.0 }
 0x138   :  { %1586 = vst [vmem:[%s3384_s2 + $0x220] sm:$0xff] %v1585_v41  ;;  %v266_v41 = vld [vmem:[%s3382_s0 + $0x7f8] sm:$0xff] }
 0x139   :  { %1113 = vst.msk [vmem:[#allocation2 + $0x230] sm:$0xff] %vm1042_vm1, %v813_v34  ;;  %v524_v34 = vmul.f32 %v1734_v4, %v262_v22  ;;  %v528_v50 = vmul.f32 %v1734_v4, %v266_v41 }
 0x13a   :  { %1112 = vst.msk [vmem:[#allocation2 + $0x228] sm:$0xff] %vm1042_vm1, %v809_v35  ;;  %992 = vadd.xlane.f32.xlu1 %v991_v38  ;;  %988 = vadd.xlane.f32.xlu0 %v987_v39  ;;  %v521_v35 = vmul.f32 %v1732_v3, %v259_v29  ;;  %v1022_v38 = vsel %vm529_vm0, %v520_v32, 0.0  ;;  %v523_v39 = vmul.f32 %v1732_v3, %v261_v33 }
 0x13b   :  { %1114 = vst.msk [vmem:[#allocation2 + $0x238] sm:$0xff] %vm1042_vm1, %v817_v40  ;;  %996 = vadd.xlane.f32.xlu2 %v995_v42  ;;  %v1030_v40 = vsel %vm529_vm0, %v524_v34, 0.0  ;;  %v264_v42 = vld [vmem:[%s3382_s0 + $0x7e8] sm:$0xff]  ;;  %v1023_v46 = vadd.f32 %v1022_v38, %v519_v36 }
 0x13c   :  { %v1027_v45 = vadd.f32 %v1026_v37, %v521_v35  ;;  %v1031_v48 = vadd.f32 %v1030_v40, %v523_v39  ;;  %v526_v52 = vmul.f32 %v1734_v4, %v264_v42  ;;  %v1038_v4 = vsel %vm529_vm0, %v528_v50, 0.0 }
 0x13d   :  { %v825_v57 = vpop.xlane.xlu1 %824  ;;  %v821_v58 = vpop.xlane.xlu0 %820 }
 0x13e   :  { %1116 = vst.msk [vmem:[#allocation2 + $0x248] sm:$0xff] %vm1042_vm1, %v825_v57  ;;  %v829_v62 = vpop.xlane.xlu2 %828  ;;  %v525_v57 = vmul.f32 %v1732_v3, %v263_v51 }
 0x13f   :  { %1115 = vst.msk [vmem:[#allocation2 + $0x240] sm:$0xff] %vm1042_vm1, %v821_v58  ;;  %v1034_v58 = vsel %vm529_vm0, %v526_v52, 0.0 }
 0x140   :  { %v1589_v6 = vld [vmem:[#allocation2 + $0x230] sm:$0xff]  ;;  %1117 = vst.msk [vmem:[#allocation2 + $0x250] sm:$0xff] %vm1042_vm1, %v829_v62  ;;  %v1035_v0 = vadd.f32 %v1034_v58, %v525_v57 }
 0x141   :  { %1590 = vst [vmem:[%s3384_s2 + $0x230] sm:$0xff] %v1589_v6  ;;  %v1587_v9 = vld [vmem:[#allocation2 + $0x228] sm:$0xff] }
 0x142   :  { %1588 = vst [vmem:[%s3384_s2 + $0x228] sm:$0xff] %v1587_v9  ;;  %v1591_v10 = vld [vmem:[#allocation2 + $0x238] sm:$0xff]  ;;  %1004 = vadd.xlane.f32.xlu1 %v1003_v60  ;;  %1000 = vadd.xlane.f32.xlu0 %v999_v61 }
 0x143   :  { %1592 = vst [vmem:[%s3384_s2 + $0x238] sm:$0xff] %v1591_v10  ;;  %1008 = vadd.xlane.f32.xlu2 %v1007_v63  ;;  %v1039_v63 = vadd.f32 %v1038_v4, %v527_v56 }
 0x145   :  { %v1595_v19 = vld [vmem:[#allocation2 + $0x248] sm:$0xff]  ;;  %v837_v20 = vpop.xlane.xlu1 %836  ;;  %v833_v21 = vpop.xlane.xlu0 %832 }
 0x146   :  { %1596 = vst [vmem:[%s3384_s2 + $0x248] sm:$0xff] %v1595_v19  ;;  %v1593_v23 = vld [vmem:[#allocation2 + $0x240] sm:$0xff]  ;;  %v841_v26 = vpop.xlane.xlu2 %840 }
 0x147   :  { %1594 = vst [vmem:[%s3384_s2 + $0x240] sm:$0xff] %v1593_v23  ;;  %v1597_v27 = vld [vmem:[#allocation2 + $0x250] sm:$0xff] }
 0x148   :  { %1598 = vst [vmem:[%s3384_s2 + $0x250] sm:$0xff] %v1597_v27 }
 0x149   :  { %1119 = vst.msk [vmem:[#allocation2 + $0x260] sm:$0xff] %vm1042_vm1, %v837_v20 }
 0x14a   :  { %1118 = vst.msk [vmem:[#allocation2 + $0x258] sm:$0xff] %vm1042_vm1, %v833_v21  ;;  %1016 = vadd.xlane.f32.xlu1 %v1015_v24  ;;  %1012 = vadd.xlane.f32.xlu0 %v1011_v25 }
 0x14b   :  { %1120 = vst.msk [vmem:[#allocation2 + $0x268] sm:$0xff] %vm1042_vm1, %v841_v26  ;;  %1020 = vadd.xlane.f32.xlu2 %v1019_v28 }
 0x14d   :  { %v849_v43 = vpop.xlane.xlu1 %848  ;;  %v845_v44 = vpop.xlane.xlu0 %844 }
 0x14e   :  { %1122 = vst.msk [vmem:[#allocation2 + $0x278] sm:$0xff] %vm1042_vm1, %v849_v43  ;;  %v853_v47 = vpop.xlane.xlu2 %852 }
 0x14f   :  { %1121 = vst.msk [vmem:[#allocation2 + $0x270] sm:$0xff] %vm1042_vm1, %v845_v44 }
 0x150   :  { %v1601_v53 = vld [vmem:[#allocation2 + $0x260] sm:$0xff]  ;;  %1123 = vst.msk [vmem:[#allocation2 + $0x280] sm:$0xff] %vm1042_vm1, %v853_v47 }
 0x151   :  { %1602 = vst [vmem:[%s3384_s2 + $0x260] sm:$0xff] %v1601_v53  ;;  %v1599_v54 = vld [vmem:[#allocation2 + $0x258] sm:$0xff] }
 0x152   :  { %1600 = vst [vmem:[%s3384_s2 + $0x258] sm:$0xff] %v1599_v54  ;;  %v1603_v55 = vld [vmem:[#allocation2 + $0x268] sm:$0xff]  ;;  %1028 = vadd.xlane.f32.xlu1 %v1027_v45  ;;  %1024 = vadd.xlane.f32.xlu0 %v1023_v46 }
 0x153   :  { %1604 = vst [vmem:[%s3384_s2 + $0x268] sm:$0xff] %v1603_v55  ;;  %1032 = vadd.xlane.f32.xlu2 %v1031_v48 }
 0x155   :  { %v1607_v59 = vld [vmem:[#allocation2 + $0x278] sm:$0xff]  ;;  %v861_v60 = vpop.xlane.xlu1 %860  ;;  %v857_v61 = vpop.xlane.xlu0 %856 }
 0x156   :  { %1608 = vst [vmem:[%s3384_s2 + $0x278] sm:$0xff] %v1607_v59  ;;  %v1605_v62 = vld [vmem:[#allocation2 + $0x270] sm:$0xff]  ;;  %v865_v3 = vpop.xlane.xlu2 %864 }
 0x157   :  { %1606 = vst [vmem:[%s3384_s2 + $0x270] sm:$0xff] %v1605_v62  ;;  %v1609_v1 = vld [vmem:[#allocation2 + $0x280] sm:$0xff] }
 0x158   :  { %1610 = vst [vmem:[%s3384_s2 + $0x280] sm:$0xff] %v1609_v1 }
 0x159   :  { %1125 = vst.msk [vmem:[#allocation2 + $0x290] sm:$0xff] %vm1042_vm1, %v861_v60 }
 0x15a   :  { %1124 = vst.msk [vmem:[#allocation2 + $0x288] sm:$0xff] %vm1042_vm1, %v857_v61  ;;  %1040 = vadd.xlane.f32.xlu1 %v1039_v63  ;;  %1036 = vadd.xlane.f32.xlu0 %v1035_v0 }
 0x15b   :  { %1126 = vst.msk [vmem:[#allocation2 + $0x298] sm:$0xff] %vm1042_vm1, %v865_v3 }
 0x15d   :  { %v873_v2 = vpop.xlane.xlu1 %872  ;;  %v869_v5 = vpop.xlane.xlu0 %868 }
 0x15e   :  { %1128 = vst.msk [vmem:[#allocation2 + $0x2a8] sm:$0xff] %vm1042_vm1, %v873_v2  ;;  %v877_v6 = vpop.xlane.xlu2 %876 }
 0x15f   :  { %1127 = vst.msk [vmem:[#allocation2 + $0x2a0] sm:$0xff] %vm1042_vm1, %v869_v5 }
 0x160   :  { %v1613_v7 = vld [vmem:[#allocation2 + $0x290] sm:$0xff]  ;;  %1129 = vst.msk [vmem:[#allocation2 + $0x2b0] sm:$0xff] %vm1042_vm1, %v877_v6 }
 0x161   :  { %1614 = vst [vmem:[%s3384_s2 + $0x290] sm:$0xff] %v1613_v7  ;;  %v1611_v8 = vld [vmem:[#allocation2 + $0x288] sm:$0xff] }
 0x162   :  { %1612 = vst [vmem:[%s3384_s2 + $0x288] sm:$0xff] %v1611_v8  ;;  %v1615_v9 = vld [vmem:[#allocation2 + $0x298] sm:$0xff] }
 0x163   :  { %1616 = vst [vmem:[%s3384_s2 + $0x298] sm:$0xff] %v1615_v9 }
 0x165   :  { %v1619_v10 = vld [vmem:[#allocation2 + $0x2a8] sm:$0xff]  ;;  %v885_v11 = vpop.xlane.xlu1 %884  ;;  %v881_v12 = vpop.xlane.xlu0 %880 }
 0x166   :  { %1620 = vst [vmem:[%s3384_s2 + $0x2a8] sm:$0xff] %v1619_v10  ;;  %v1617_v13 = vld [vmem:[#allocation2 + $0x2a0] sm:$0xff]  ;;  %v889_v14 = vpop.xlane.xlu2 %888 }
 0x167   :  { %1618 = vst [vmem:[%s3384_s2 + $0x2a0] sm:$0xff] %v1617_v13  ;;  %v1621_v15 = vld [vmem:[#allocation2 + $0x2b0] sm:$0xff] }
 0x168   :  { %1622 = vst [vmem:[%s3384_s2 + $0x2b0] sm:$0xff] %v1621_v15 }
 0x169   :  { %1131 = vst.msk [vmem:[#allocation2 + $0x2c0] sm:$0xff] %vm1042_vm1, %v885_v11 }
 0x16a   :  { %1130 = vst.msk [vmem:[#allocation2 + $0x2b8] sm:$0xff] %vm1042_vm1, %v881_v12 }
 0x16b   :  { %1132 = vst.msk [vmem:[#allocation2 + $0x2c8] sm:$0xff] %vm1042_vm1, %v889_v14 }
 0x16d   :  { %v897_v16 = vpop.xlane.xlu1 %896  ;;  %v893_v17 = vpop.xlane.xlu0 %892 }
 0x16e   :  { %1134 = vst.msk [vmem:[#allocation2 + $0x2d8] sm:$0xff] %vm1042_vm1, %v897_v16  ;;  %v901_v18 = vpop.xlane.xlu2 %900 }
 0x16f   :  { %1133 = vst.msk [vmem:[#allocation2 + $0x2d0] sm:$0xff] %vm1042_vm1, %v893_v17 }
 0x170   :  { %v1625_v19 = vld [vmem:[#allocation2 + $0x2c0] sm:$0xff]  ;;  %1135 = vst.msk [vmem:[#allocation2 + $0x2e0] sm:$0xff] %vm1042_vm1, %v901_v18 }
 0x171   :  { %1626 = vst [vmem:[%s3384_s2 + $0x2c0] sm:$0xff] %v1625_v19  ;;  %v1623_v20 = vld [vmem:[#allocation2 + $0x2b8] sm:$0xff] }
 0x172   :  { %1624 = vst [vmem:[%s3384_s2 + $0x2b8] sm:$0xff] %v1623_v20  ;;  %v1627_v21 = vld [vmem:[#allocation2 + $0x2c8] sm:$0xff] }
 0x173   :  { %1628 = vst [vmem:[%s3384_s2 + $0x2c8] sm:$0xff] %v1627_v21 }
 0x175   :  { %v1631_v22 = vld [vmem:[#allocation2 + $0x2d8] sm:$0xff]  ;;  %v909_v23 = vpop.xlane.xlu1 %908  ;;  %v905_v24 = vpop.xlane.xlu0 %904 }
 0x176   :  { %1632 = vst [vmem:[%s3384_s2 + $0x2d8] sm:$0xff] %v1631_v22  ;;  %v1629_v25 = vld [vmem:[#allocation2 + $0x2d0] sm:$0xff]  ;;  %v913_v26 = vpop.xlane.xlu2 %912 }
 0x177   :  { %1630 = vst [vmem:[%s3384_s2 + $0x2d0] sm:$0xff] %v1629_v25  ;;  %v1633_v27 = vld [vmem:[#allocation2 + $0x2e0] sm:$0xff] }
 0x178   :  { %1634 = vst [vmem:[%s3384_s2 + $0x2e0] sm:$0xff] %v1633_v27 }
 0x179   :  { %1137 = vst.msk [vmem:[#allocation2 + $0x2f0] sm:$0xff] %vm1042_vm1, %v909_v23 }
 0x17a   :  { %1136 = vst.msk [vmem:[#allocation2 + $0x2e8] sm:$0xff] %vm1042_vm1, %v905_v24 }
 0x17b   :  { %1138 = vst.msk [vmem:[#allocation2 + $0x2f8] sm:$0xff] %vm1042_vm1, %v913_v26 }
 0x17d   :  { %v921_v28 = vpop.xlane.xlu1 %920  ;;  %v917_v29 = vpop.xlane.xlu0 %916 }
 0x17e   :  { %1140 = vst.msk [vmem:[#allocation2 + $0x308] sm:$0xff] %vm1042_vm1, %v921_v28  ;;  %v925_v30 = vpop.xlane.xlu2 %924 }
 0x17f   :  { %1139 = vst.msk [vmem:[#allocation2 + $0x300] sm:$0xff] %vm1042_vm1, %v917_v29 }
 0x180   :  { %v1637_v31 = vld [vmem:[#allocation2 + $0x2f0] sm:$0xff]  ;;  %1141 = vst.msk [vmem:[#allocation2 + $0x310] sm:$0xff] %vm1042_vm1, %v925_v30 }
 0x181   :  { %1638 = vst [vmem:[%s3384_s2 + $0x2f0] sm:$0xff] %v1637_v31  ;;  %v1635_v32 = vld [vmem:[#allocation2 + $0x2e8] sm:$0xff] }
 0x182   :  { %1636 = vst [vmem:[%s3384_s2 + $0x2e8] sm:$0xff] %v1635_v32  ;;  %v1639_v33 = vld [vmem:[#allocation2 + $0x2f8] sm:$0xff] }
 0x183   :  { %1640 = vst [vmem:[%s3384_s2 + $0x2f8] sm:$0xff] %v1639_v33 }
 0x185   :  { %v1643_v34 = vld [vmem:[#allocation2 + $0x308] sm:$0xff]  ;;  %v933_v35 = vpop.xlane.xlu1 %932  ;;  %v929_v36 = vpop.xlane.xlu0 %928 }
 0x186   :  { %1644 = vst [vmem:[%s3384_s2 + $0x308] sm:$0xff] %v1643_v34  ;;  %v1641_v37 = vld [vmem:[#allocation2 + $0x300] sm:$0xff]  ;;  %v937_v38 = vpop.xlane.xlu2 %936 }
 0x187   :  { %1642 = vst [vmem:[%s3384_s2 + $0x300] sm:$0xff] %v1641_v37  ;;  %v1645_v39 = vld [vmem:[#allocation2 + $0x310] sm:$0xff] }
 0x188   :  { %1646 = vst [vmem:[%s3384_s2 + $0x310] sm:$0xff] %v1645_v39 }
 0x189   :  { %1143 = vst.msk [vmem:[#allocation2 + $0x320] sm:$0xff] %vm1042_vm1, %v933_v35 }
 0x18a   :  { %1142 = vst.msk [vmem:[#allocation2 + $0x318] sm:$0xff] %vm1042_vm1, %v929_v36 }
 0x18b   :  { %1144 = vst.msk [vmem:[#allocation2 + $0x328] sm:$0xff] %vm1042_vm1, %v937_v38 }
 0x18d   :  { %v945_v40 = vpop.xlane.xlu1 %944  ;;  %v941_v41 = vpop.xlane.xlu0 %940 }
 0x18e   :  { %1146 = vst.msk [vmem:[#allocation2 + $0x338] sm:$0xff] %vm1042_vm1, %v945_v40  ;;  %v949_v42 = vpop.xlane.xlu2 %948 }
 0x18f   :  { %1145 = vst.msk [vmem:[#allocation2 + $0x330] sm:$0xff] %vm1042_vm1, %v941_v41 }
 0x190   :  { %v1649_v43 = vld [vmem:[#allocation2 + $0x320] sm:$0xff]  ;;  %1147 = vst.msk [vmem:[#allocation2 + $0x340] sm:$0xff] %vm1042_vm1, %v949_v42 }
 0x191   :  { %1650 = vst [vmem:[%s3384_s2 + $0x320] sm:$0xff] %v1649_v43  ;;  %v1647_v44 = vld [vmem:[#allocation2 + $0x318] sm:$0xff] }
 0x192   :  { %1648 = vst [vmem:[%s3384_s2 + $0x318] sm:$0xff] %v1647_v44  ;;  %v1651_v45 = vld [vmem:[#allocation2 + $0x328] sm:$0xff] }
 0x193   :  { %1652 = vst [vmem:[%s3384_s2 + $0x328] sm:$0xff] %v1651_v45 }
 0x195   :  { %v1655_v46 = vld [vmem:[#allocation2 + $0x338] sm:$0xff]  ;;  %v957_v47 = vpop.xlane.xlu1 %956  ;;  %v953_v48 = vpop.xlane.xlu0 %952 }
 0x196   :  { %1656 = vst [vmem:[%s3384_s2 + $0x338] sm:$0xff] %v1655_v46  ;;  %v1653_v49 = vld [vmem:[#allocation2 + $0x330] sm:$0xff]  ;;  %v961_v50 = vpop.xlane.xlu2 %960 }
 0x197   :  { %1654 = vst [vmem:[%s3384_s2 + $0x330] sm:$0xff] %v1653_v49  ;;  %v1657_v51 = vld [vmem:[#allocation2 + $0x340] sm:$0xff] }
 0x198   :  { %1658 = vst [vmem:[%s3384_s2 + $0x340] sm:$0xff] %v1657_v51 }
 0x199   :  { %1149 = vst.msk [vmem:[#allocation2 + $0x350] sm:$0xff] %vm1042_vm1, %v957_v47 }
 0x19a   :  { %1148 = vst.msk [vmem:[#allocation2 + $0x348] sm:$0xff] %vm1042_vm1, %v953_v48 }
 0x19b   :  { %1150 = vst.msk [vmem:[#allocation2 + $0x358] sm:$0xff] %vm1042_vm1, %v961_v50 }
 0x19d   :  { %v969_v52 = vpop.xlane.xlu1 %968  ;;  %v965_v53 = vpop.xlane.xlu0 %964 }
 0x19e   :  { %1152 = vst.msk [vmem:[#allocation2 + $0x368] sm:$0xff] %vm1042_vm1, %v969_v52  ;;  %v973_v54 = vpop.xlane.xlu2 %972 }
 0x19f   :  { %1151 = vst.msk [vmem:[#allocation2 + $0x360] sm:$0xff] %vm1042_vm1, %v965_v53 }
 0x1a0   :  { %v1661_v55 = vld [vmem:[#allocation2 + $0x350] sm:$0xff]  ;;  %1153 = vst.msk [vmem:[#allocation2 + $0x370] sm:$0xff] %vm1042_vm1, %v973_v54 }
 0x1a1   :  { %1662 = vst [vmem:[%s3384_s2 + $0x350] sm:$0xff] %v1661_v55  ;;  %v1659_v56 = vld [vmem:[#allocation2 + $0x348] sm:$0xff] }
 0x1a2   :  { %1660 = vst [vmem:[%s3384_s2 + $0x348] sm:$0xff] %v1659_v56  ;;  %v1663_v57 = vld [vmem:[#allocation2 + $0x358] sm:$0xff] }
 0x1a3   :  { %1664 = vst [vmem:[%s3384_s2 + $0x358] sm:$0xff] %v1663_v57 }
 0x1a5   :  { %v1667_v4 = vld [vmem:[#allocation2 + $0x368] sm:$0xff]  ;;  %v981_v58 = vpop.xlane.xlu1 %980  ;;  %v977_v59 = vpop.xlane.xlu0 %976 }
 0x1a6   :  { %1668 = vst [vmem:[%s3384_s2 + $0x368] sm:$0xff] %v1667_v4  ;;  %v1665_v60 = vld [vmem:[#allocation2 + $0x360] sm:$0xff]  ;;  %v985_v61 = vpop.xlane.xlu2 %984 }
 0x1a7   :  { %1666 = vst [vmem:[%s3384_s2 + $0x360] sm:$0xff] %v1665_v60  ;;  %v1669_v62 = vld [vmem:[#allocation2 + $0x370] sm:$0xff] }
 0x1a8   :  { %1670 = vst [vmem:[%s3384_s2 + $0x370] sm:$0xff] %v1669_v62 }
 0x1a9   :  { %1155 = vst.msk [vmem:[#allocation2 + $0x380] sm:$0xff] %vm1042_vm1, %v981_v58 }
 0x1aa   :  { %1154 = vst.msk [vmem:[#allocation2 + $0x378] sm:$0xff] %vm1042_vm1, %v977_v59 }
 0x1ab   :  { %1156 = vst.msk [vmem:[#allocation2 + $0x388] sm:$0xff] %vm1042_vm1, %v985_v61 }
 0x1ad   :  { %v993_v63 = vpop.xlane.xlu1 %992  ;;  %v989_v0 = vpop.xlane.xlu0 %988 }
 0x1ae   :  { %1158 = vst.msk [vmem:[#allocation2 + $0x398] sm:$0xff] %vm1042_vm1, %v993_v63  ;;  %v997_v3 = vpop.xlane.xlu2 %996 }
 0x1af   :  { %1157 = vst.msk [vmem:[#allocation2 + $0x390] sm:$0xff] %vm1042_vm1, %v989_v0 }
 0x1b0   :  { %v1673_v1 = vld [vmem:[#allocation2 + $0x380] sm:$0xff]  ;;  %1159 = vst.msk [vmem:[#allocation2 + $0x3a0] sm:$0xff] %vm1042_vm1, %v997_v3 }
 0x1b1   :  { %1674 = vst [vmem:[%s3384_s2 + $0x380] sm:$0xff] %v1673_v1  ;;  %v1671_v2 = vld [vmem:[#allocation2 + $0x378] sm:$0xff] }
 0x1b2   :  { %1672 = vst [vmem:[%s3384_s2 + $0x378] sm:$0xff] %v1671_v2  ;;  %v1675_v5 = vld [vmem:[#allocation2 + $0x388] sm:$0xff] }
 0x1b3   :  { %1676 = vst [vmem:[%s3384_s2 + $0x388] sm:$0xff] %v1675_v5 }
 0x1b5   :  { %v1679_v6 = vld [vmem:[#allocation2 + $0x398] sm:$0xff]  ;;  %v1005_v7 = vpop.xlane.xlu1 %1004  ;;  %v1001_v8 = vpop.xlane.xlu0 %1000 }
 0x1b6   :  { %1680 = vst [vmem:[%s3384_s2 + $0x398] sm:$0xff] %v1679_v6  ;;  %v1677_v9 = vld [vmem:[#allocation2 + $0x390] sm:$0xff]  ;;  %v1009_v10 = vpop.xlane.xlu2 %1008 }
 0x1b7   :  { %1678 = vst [vmem:[%s3384_s2 + $0x390] sm:$0xff] %v1677_v9  ;;  %v1681_v11 = vld [vmem:[#allocation2 + $0x3a0] sm:$0xff] }
 0x1b8   :  { %1682 = vst [vmem:[%s3384_s2 + $0x3a0] sm:$0xff] %v1681_v11 }
 0x1b9   :  { %1161 = vst.msk [vmem:[#allocation2 + $0x3b0] sm:$0xff] %vm1042_vm1, %v1005_v7 }
 0x1ba   :  { %1160 = vst.msk [vmem:[#allocation2 + $0x3a8] sm:$0xff] %vm1042_vm1, %v1001_v8 }
 0x1bb   :  { %1162 = vst.msk [vmem:[#allocation2 + $0x3b8] sm:$0xff] %vm1042_vm1, %v1009_v10 }
 0x1bd   :  { %v1017_v12 = vpop.xlane.xlu1 %1016  ;;  %v1013_v13 = vpop.xlane.xlu0 %1012 }
 0x1be   :  { %1164 = vst.msk [vmem:[#allocation2 + $0x3c8] sm:$0xff] %vm1042_vm1, %v1017_v12  ;;  %v1021_v14 = vpop.xlane.xlu2 %1020 }
 0x1bf   :  { %1163 = vst.msk [vmem:[#allocation2 + $0x3c0] sm:$0xff] %vm1042_vm1, %v1013_v13 }
 0x1c0   :  { %v1685_v15 = vld [vmem:[#allocation2 + $0x3b0] sm:$0xff]  ;;  %1165 = vst.msk [vmem:[#allocation2 + $0x3d0] sm:$0xff] %vm1042_vm1, %v1021_v14 }
 0x1c1   :  { %1686 = vst [vmem:[%s3384_s2 + $0x3b0] sm:$0xff] %v1685_v15  ;;  %v1683_v16 = vld [vmem:[#allocation2 + $0x3a8] sm:$0xff] }
 0x1c2   :  { %1684 = vst [vmem:[%s3384_s2 + $0x3a8] sm:$0xff] %v1683_v16  ;;  %v1687_v17 = vld [vmem:[#allocation2 + $0x3b8] sm:$0xff] }
 0x1c3   :  { %1688 = vst [vmem:[%s3384_s2 + $0x3b8] sm:$0xff] %v1687_v17 }
 0x1c5   :  { %v1691_v18 = vld [vmem:[#allocation2 + $0x3c8] sm:$0xff]  ;;  %v1029_v19 = vpop.xlane.xlu1 %1028  ;;  %v1025_v20 = vpop.xlane.xlu0 %1024 }
 0x1c6   :  { %1692 = vst [vmem:[%s3384_s2 + $0x3c8] sm:$0xff] %v1691_v18  ;;  %v1689_v21 = vld [vmem:[#allocation2 + $0x3c0] sm:$0xff]  ;;  %v1033_v23 = vpop.xlane.xlu2 %1032 }
 0x1c7   :  { %1690 = vst [vmem:[%s3384_s2 + $0x3c0] sm:$0xff] %v1689_v21  ;;  %v1693_v22 = vld [vmem:[#allocation2 + $0x3d0] sm:$0xff] }
 0x1c8   :  { %1694 = vst [vmem:[%s3384_s2 + $0x3d0] sm:$0xff] %v1693_v22 }
 0x1c9   :  { %1167 = vst.msk [vmem:[#allocation2 + $0x3e0] sm:$0xff] %vm1042_vm1, %v1029_v19 }
 0x1ca   :  { %1166 = vst.msk [vmem:[#allocation2 + $0x3d8] sm:$0xff] %vm1042_vm1, %v1025_v20 }
 0x1cd   :  { %v1041_v24 = vpop.xlane.xlu1 %1040  ;;  %v1037_v25 = vpop.xlane.xlu0 %1036 }
 0x1d0   :  { %v1697_v26 = vld [vmem:[#allocation2 + $0x3e0] sm:$0xff] }
 0x1d1   :  { %1698 = vst [vmem:[%s3384_s2 + $0x3e0] sm:$0xff] %v1697_v26  ;;  %v1695_v27 = vld [vmem:[#allocation2 + $0x3d8] sm:$0xff] }
 0x1d2   :  { %1696 = vst [vmem:[%s3384_s2 + $0x3d8] sm:$0xff] %v1695_v27 }

</bundles_post_ra>
